<compile_context>
chip_gen: v5e
topology: v5e:2x2
jax: 0.10.0
libtpu: 0.0.40
codegen_flags: <defaults>
</compile_context>

<pallas_src>
import functools

import jax
import jax.numpy as jnp
from jax.experimental import pallas as pl
from jax.experimental.pallas import tpu as pltpu


# --------------------------------------------------------------------------
# One fused kernel: encoder + heads + reparam + full autoregressive decoder
# --------------------------------------------------------------------------
def _cvae_kernel(teacher_force,
                 x_enc_ref, h0_ref, enc_wih_ref, enc_whh_ref, enc_b_ref,
                 head_w_ref, head_b_ref, eps_ref, tgt_cond_ref,
                 l2h_wz_ref, l2h_wc_ref, l2h_b_ref,
                 dec_wih_ref, dec_whh_ref, dec_b_ref,
                 out_w_ref, out_b_ref, x_dec_ref, dec_emb_ref,
                 logits_ref, musig_ref):
    Hp = h0_ref.shape[1]             # hidden_dim + condition_dim
    L = eps_ref.shape[1]             # latent_dim
    Vp = out_w_ref.shape[1]          # padded vocab (multiple of 128)
    T = x_enc_ref.shape[0]           # encoder sequence length
    max_len = x_dec_ref.shape[0]     # decoder sequence length

    def lstm_step(x, h, c, wih_ref, whh_ref, b_ref):
        # gates ordered [i, f, g, o] like torch.nn.LSTM; bias = b_ih + b_hh combined
        gates = (jnp.dot(x, wih_ref[...], preferred_element_type=jnp.float32)
                 + jnp.dot(h, whh_ref[...], preferred_element_type=jnp.float32)
                 + b_ref[...])                              # (1, 4*Hp) = one 128-lane vreg
        sg = jax.nn.sigmoid(gates)                          # full-vreg EUP call
        th = jnp.tanh(gates)                                # full-vreg EUP call
        i = sg[:, 0:Hp]
        f = sg[:, Hp:2 * Hp]
        g = th[:, 2 * Hp:3 * Hp]
        o = sg[:, 3 * Hp:4 * Hp]
        c_new = f * c + i * g
        h_new = o * jnp.tanh(c_new)
        return h_new, c_new

    # ----------------- encoder LSTM over the resident input sequence -----------------
    h = h0_ref[...]
    c = jnp.zeros_like(h)
    for k in range(T):                                      # static unroll
        x_k = x_enc_ref[pl.ds(k, 1), :]                     # (1, E)
        h, c = lstm_step(x_k, h, c, enc_wih_ref, enc_whh_ref, enc_b_ref)

    # ----------------- stacked [mu | sigma] head + reparameterization ----------------
    musig = (jnp.dot(h, head_w_ref[...], preferred_element_type=jnp.float32)
             + head_b_ref[...])                             # (1, 2*L)
    musig_ref[...] = musig
    mu = musig[:, 0:L]
    sig = musig[:, L:2 * L]
    z = eps_ref[...] * jnp.exp(sig * 0.5) + mu

    # --------- latent2hidden(cat(z, target_condition)) as split-weight matmuls -------
    h_dec = (jnp.dot(z, l2h_wz_ref[...], preferred_element_type=jnp.float32)
             + jnp.dot(tgt_cond_ref[...], l2h_wc_ref[...],
                       preferred_element_type=jnp.float32)
             + l2h_b_ref[...])                              # (1, Hp)
    c_dec = jnp.zeros_like(h_dec)

    # ----------------------------- autoregressive decoder ----------------------------
    logits_ref[...] = jnp.zeros_like(logits_ref)            # outputs[0] stays zero
    prev = None                                             # previous-step logits (greedy)
    for t in range(1, max_len):                             # static unroll
        if teacher_force or t == 1:
            x = x_dec_ref[pl.ds(t - 1, 1), :]               # (1, E) emb(target_word[:, t-1])
        else:
            # greedy: first-argmax of previous logits + embedding row select (one-hot dot)
            col = jax.lax.broadcasted_iota(jnp.int32, prev.shape, 1)
            mx = jnp.max(prev, axis=1, keepdims=True)
            idx = jnp.min(jnp.where(prev >= mx, col, Vp), axis=1, keepdims=True)
            onehot = (col == idx).astype(jnp.float32)       # (1, Vp)
            x = jnp.dot(onehot, dec_emb_ref[...],
                        preferred_element_type=jnp.float32)  # (1, E)

        h_dec, c_dec = lstm_step(x, h_dec, c_dec, dec_wih_ref, dec_whh_ref, dec_b_ref)
        logits = (jnp.dot(h_dec, out_w_ref[...], preferred_element_type=jnp.float32)
                  + out_b_ref[...])                         # (1, Vp)
        logits_ref[pl.ds(t, 1), :] = logits
        prev = logits


# --------------------------------------------------------------------------
# Parameter init (deterministic, synthetic)
# --------------------------------------------------------------------------
def init_params(key, io_dim, embedding_dim, hidden_dim, condition_dim, latent_dim):
    Hp = hidden_dim + condition_dim
    Vp = ((io_dim + 127) // 128) * 128                      # lane-padded vocab
    ks = jax.random.split(key, 18)
    n = lambda k, shape: (0.1 * jax.random.normal(k, shape)).astype(jnp.float32)

    out_w = jnp.zeros((Hp, Vp), jnp.float32).at[:, :io_dim].set(n(ks[16], (Hp, io_dim)))
    # padded vocab lanes get a huge negative bias so greedy argmax never selects them
    out_b = jnp.full((1, Vp), -1e9, jnp.float32).at[:, :io_dim].set(0.0)
    dec_emb = n(ks[9], (io_dim, embedding_dim))
    dec_emb_pad = jnp.zeros((Vp, embedding_dim), jnp.float32).at[:io_dim].set(dec_emb)

    return {
        "io_dim": io_dim,
        "io_dim_padded": Vp,
        "embedding_dim": embedding_dim,
        "hidden_dim": hidden_dim,
        "condition_dim": condition_dim,
        "latent_dim": latent_dim,
        # shared condition embedding (4 tenses)
        "cond_emb": n(ks[0], (4, condition_dim)),
        # encoder
        "enc_emb": n(ks[1], (io_dim, embedding_dim)),
        "enc_wih": n(ks[2], (embedding_dim, 4 * Hp)),
        "enc_whh": n(ks[3], (Hp, 4 * Hp)),
        "enc_b": n(ks[4], (1, 4 * Hp)),                     # b_ih + b_hh combined
        "head_w": jnp.concatenate([n(ks[5], (Hp, latent_dim)),   # [wmu | wsig]
                                   n(ks[6], (Hp, latent_dim))], axis=1),
        "head_b": jnp.concatenate([n(ks[7], (1, latent_dim)),
                                   n(ks[8], (1, latent_dim))], axis=1),
        # decoder
        "dec_emb": dec_emb,
        "dec_emb_pad": dec_emb_pad,
        "l2h_wz": n(ks[10], (latent_dim, Hp)),              # latent2hidden split rows
        "l2h_wc": n(ks[11], (condition_dim, Hp)),
        "l2h_b": n(ks[12], (1, Hp)),
        "dec_wih": n(ks[13], (embedding_dim, 4 * Hp)),
        "dec_whh": n(ks[14], (Hp, 4 * Hp)),
        "dec_b": n(ks[15], (1, 4 * Hp)),
        "out_w": out_w,
        "out_b": out_b,
    }


# --------------------------------------------------------------------------
# Full EncoderDecoder forward — single pallas_call, single grid point
# --------------------------------------------------------------------------
def encoder_decoder_forward(params, input_word, input_tense, target_word,
                            target_tense, eps, teacher_force=True):
    hidden_dim = params["hidden_dim"]
    C = params["condition_dim"]
    L = params["latent_dim"]
    E = params["embedding_dim"]
    V = params["io_dim"]
    Vp = params["io_dim_padded"]
    Hp = hidden_dim + C
    max_len = target_word.shape[1]

    in_cond = jnp.take(params["cond_emb"], input_tense, axis=0).reshape(1, C)
    tgt_cond = jnp.take(params["cond_emb"], target_tense, axis=0).reshape(1, C)

    # encoder consumes input_word[:, 1:-1] (SOS / EOS stripped), like the torch module
    enc_tokens = input_word[0, 1:-1]
    x_enc = jnp.take(params["enc_emb"], enc_tokens, axis=0)            # (T, E)
    T = x_enc.shape[0]
    h0 = jnp.concatenate([jnp.zeros((1, hidden_dim), jnp.float32), in_cond], axis=1)

    # pre-gathered teacher-forcing decoder inputs: decoder step t uses row t-1
    x_dec = jnp.take(params["dec_emb"], target_word[0], axis=0)        # (max_len, E)

    def resident(shape):
        return pl.BlockSpec(shape, lambda t, _n=len(shape): (0,) * _n)

    kernel = functools.partial(_cvae_kernel, bool(teacher_force))

    logits_pad, musig = pl.pallas_call(
        kernel,
        grid=(1,),
        in_specs=[
            resident((T, E)),               # x_enc (whole sequence resident)
            resident((1, Hp)),              # h0 = [zeros, input condition]
            resident((E, 4 * Hp)),          # enc_wih
            resident((Hp, 4 * Hp)),         # enc_whh
            resident((1, 4 * Hp)),          # enc_b
            resident((Hp, 2 * L)),          # head_w = [wmu | wsig]
            resident((1, 2 * L)),           # head_b
            resident((1, L)),               # eps (sample_z)
            resident((1, C)),               # target condition embedding
            resident((L, Hp)),              # latent2hidden (z rows)
            resident((C, Hp)),              # latent2hidden (cond rows)
            resident((1, Hp)),              # latent2hidden bias
            resident((E, 4 * Hp)),          # dec_wih
            resident((Hp, 4 * Hp)),         # dec_whh
            resident((1, 4 * Hp)),          # dec_b
            resident((Hp, Vp)),             # out_w (vocab padded to 128 lanes)
            resident((1, Vp)),              # out_b (padded lanes = -1e9)
            resident((max_len, E)),         # x_dec (teacher-forcing embeddings, resident)
            resident((Vp, E)),              # dec_emb table padded (greedy argmax lookup)
        ],
        out_specs=(
            resident((max_len, Vp)),        # logits: one dense (8,128) tile, single writeback
            resident((1, 2 * L)),           # packed [mu | sigma]
        ),
        out_shape=(
            jax.ShapeDtypeStruct((max_len, Vp), jnp.float32),
            jax.ShapeDtypeStruct((1, 2 * L), jnp.float32),
        ),
        compiler_params=pltpu.CompilerParams(dimension_semantics=("arbitrary",)),
    )(x_enc, h0, params["enc_wih"], params["enc_whh"], params["enc_b"],
      params["head_w"], params["head_b"], eps, tgt_cond,
      params["l2h_wz"], params["l2h_wc"], params["l2h_b"],
      params["dec_wih"], params["dec_whh"], params["dec_b"],
      params["out_w"], params["out_b"], x_dec, params["dec_emb_pad"])

    outputs = logits_pad[:, :V].reshape(max_len, 1, V)      # drop vocab padding
    mu = musig[:, 0:L].reshape(1, 1, L)
    sigma = musig[:, L:2 * L].reshape(1, 1, L)
    # TODO(synk): word_dropout would replace the decoder input with the UNK token id from
    # dataset.WordProcessing; that class (and the random.random() coin flips for teacher
    # forcing / dropout) is unavailable, so these are deterministic / disabled here.
    return outputs, mu, sigma


# --------------------------------------------------------------------------
if __name__ == "__main__":
    io_dim, embedding_dim, hidden_dim, condition_dim, latent_dim = 32, 16, 24, 8, 16
    # hidden_dim + condition_dim = 32, so the 4*Hp gate vector is exactly 128 lanes.

    key = jax.random.PRNGKey(0)
    k_par, k_in, k_tgt, k_eps = jax.random.split(key, 4)
    params = init_params(k_par, io_dim, embedding_dim, hidden_dim,
                         condition_dim, latent_dim)

    input_word = jax.random.randint(k_in, (1, 10), 0, io_dim, dtype=jnp.int32)
    target_word = jax.random.randint(k_tgt, (1, 8), 0, io_dim, dtype=jnp.int32)
    input_tense = jnp.array(1, jnp.int32)
    target_tense = jnp.array(2, jnp.int32)
    eps = jax.random.normal(k_eps, (1, latent_dim), jnp.float32)  # encoder.sample_z()

    # teacher-forced path (pre-gathered decoder inputs)
    outputs, mu, sigma = encoder_decoder_forward(
        params, input_word, input_tense, target_word, target_tense, eps,
        teacher_force=True)
    jax.block_until_ready((outputs, mu, sigma))
    assert outputs.shape == (8, 1, io_dim)
    assert mu.shape == (1, 1, latent_dim) and sigma.shape == (1, 1, latent_dim)

    # greedy path (in-kernel argmax + padded embedding row select)
    outputs_g, mu_g, sigma_g = encoder_decoder_forward(
        params, input_word, input_tense, target_word, target_tense, eps,
        teacher_force=False)
    jax.block_until_ready((outputs_g, mu_g, sigma_g))
    assert outputs_g.shape == (8, 1, io_dim)

    print("KERNEL_OK")
</pallas_src>

<mosaic_0001>
module attributes {stable_mosaic.version = 11 : i64} {
  func.func @_cvae_kernel(%arg0: i32, %arg1: memref<8x16xf32, #tpu.memory_space<vmem>>, %arg2: memref<1x32xf32, #tpu.memory_space<vmem>>, %arg3: memref<16x128xf32, #tpu.memory_space<vmem>>, %arg4: memref<32x128xf32, #tpu.memory_space<vmem>>, %arg5: memref<1x128xf32, #tpu.memory_space<vmem>>, %arg6: memref<32x32xf32, #tpu.memory_space<vmem>>, %arg7: memref<1x32xf32, #tpu.memory_space<vmem>>, %arg8: memref<1x16xf32, #tpu.memory_space<vmem>>, %arg9: memref<1x8xf32, #tpu.memory_space<vmem>>, %arg10: memref<16x32xf32, #tpu.memory_space<vmem>>, %arg11: memref<8x32xf32, #tpu.memory_space<vmem>>, %arg12: memref<1x32xf32, #tpu.memory_space<vmem>>, %arg13: memref<16x128xf32, #tpu.memory_space<vmem>>, %arg14: memref<32x128xf32, #tpu.memory_space<vmem>>, %arg15: memref<1x128xf32, #tpu.memory_space<vmem>>, %arg16: memref<32x128xf32, #tpu.memory_space<vmem>>, %arg17: memref<1x128xf32, #tpu.memory_space<vmem>>, %arg18: memref<8x16xf32, #tpu.memory_space<vmem>>, %arg19: memref<128x16xf32, #tpu.memory_space<vmem>>, %arg20: memref<8x128xf32, #tpu.memory_space<vmem>>, %arg21: memref<1x32xf32, #tpu.memory_space<vmem>>) attributes {dimension_semantics = [#tpu.dimension_semantics<arbitrary>], iteration_bounds = array<i64: 1>, scalar_prefetch = 0 : i64, scratch_operands = 0 : i64, tpu.core_type = #tpu.core_type<tc>, window_params = [{pipeline_mode = #tpu.pipeline_mode<synchronous>, transform_indices = @transform_0, window_bounds = array<i64: 8, 16>}, {pipeline_mode = #tpu.pipeline_mode<synchronous>, transform_indices = @transform_1, window_bounds = array<i64: 1, 32>}, {pipeline_mode = #tpu.pipeline_mode<synchronous>, transform_indices = @transform_2, window_bounds = array<i64: 16, 128>}, {pipeline_mode = #tpu.pipeline_mode<synchronous>, transform_indices = @transform_3, window_bounds = array<i64: 32, 128>}, {pipeline_mode = #tpu.pipeline_mode<synchronous>, transform_indices = @transform_4, window_bounds = array<i64: 1, 128>}, {pipeline_mode = #tpu.pipeline_mode<synchronous>, transform_indices = @transform_5, window_bounds = array<i64: 32, 32>}, {pipeline_mode = #tpu.pipeline_mode<synchronous>, transform_indices = @transform_6, window_bounds = array<i64: 1, 32>}, {pipeline_mode = #tpu.pipeline_mode<synchronous>, transform_indices = @transform_7, window_bounds = array<i64: 1, 16>}, {pipeline_mode = #tpu.pipeline_mode<synchronous>, transform_indices = @transform_8, window_bounds = array<i64: 1, 8>}, {pipeline_mode = #tpu.pipeline_mode<synchronous>, transform_indices = @transform_9, window_bounds = array<i64: 16, 32>}, {pipeline_mode = #tpu.pipeline_mode<synchronous>, transform_indices = @transform_10, window_bounds = array<i64: 8, 32>}, {pipeline_mode = #tpu.pipeline_mode<synchronous>, transform_indices = @transform_11, window_bounds = array<i64: 1, 32>}, {pipeline_mode = #tpu.pipeline_mode<synchronous>, transform_indices = @transform_12, window_bounds = array<i64: 16, 128>}, {pipeline_mode = #tpu.pipeline_mode<synchronous>, transform_indices = @transform_13, window_bounds = array<i64: 32, 128>}, {pipeline_mode = #tpu.pipeline_mode<synchronous>, transform_indices = @transform_14, window_bounds = array<i64: 1, 128>}, {pipeline_mode = #tpu.pipeline_mode<synchronous>, transform_indices = @transform_15, window_bounds = array<i64: 32, 128>}, {pipeline_mode = #tpu.pipeline_mode<synchronous>, transform_indices = @transform_16, window_bounds = array<i64: 1, 128>}, {pipeline_mode = #tpu.pipeline_mode<synchronous>, transform_indices = @transform_17, window_bounds = array<i64: 8, 16>}, {pipeline_mode = #tpu.pipeline_mode<synchronous>, transform_indices = @transform_18, window_bounds = array<i64: 128, 16>}, {pipeline_mode = #tpu.pipeline_mode<synchronous>, transform_indices = @transform_19, window_bounds = array<i64: 8, 128>}, {pipeline_mode = #tpu.pipeline_mode<synchronous>, transform_indices = @transform_20, window_bounds = array<i64: 1, 32>}]} {
    %c0 = arith.constant 0 : index
    %c0_0 = arith.constant 0 : index
    %0 = vector.load %arg2[%c0, %c0_0] : memref<1x32xf32, #tpu.memory_space<vmem>>, vector<1x32xf32>
    %cst = arith.constant 0.000000e+00 : f32
    %1 = vector.broadcast %cst : f32 to vector<1x32xf32>
    %c0_1 = arith.constant 0 : index
    %c0_2 = arith.constant 0 : index
    %2 = vector.load %arg1[%c0_1, %c0_2] : memref<8x16xf32, #tpu.memory_space<vmem>>, vector<1x16xf32>
    %c0_3 = arith.constant 0 : index
    %c0_4 = arith.constant 0 : index
    %3 = vector.load %arg3[%c0_3, %c0_4] : memref<16x128xf32, #tpu.memory_space<vmem>>, vector<16x128xf32>
    %cst_5 = arith.constant dense<0.000000e+00> : vector<1x128xf32>
    %4 = tpu.matmul %2, %3, %cst_5 {dimension_numbers = #tpu.dot_dimension_numbers<[1], [0], [0], [1], [0, 0, 1, 1], [], []>} : vector<1x16xf32>, vector<16x128xf32>, vector<1x128xf32> -> vector<1x128xf32>
    %c0_6 = arith.constant 0 : index
    %c0_7 = arith.constant 0 : index
    %5 = vector.load %arg4[%c0_6, %c0_7] : memref<32x128xf32, #tpu.memory_space<vmem>>, vector<32x128xf32>
    %cst_8 = arith.constant dense<0.000000e+00> : vector<1x128xf32>
    %6 = tpu.matmul %0, %5, %cst_8 {dimension_numbers = #tpu.dot_dimension_numbers<[1], [0], [0], [1], [0, 0, 1, 1], [], []>} : vector<1x32xf32>, vector<32x128xf32>, vector<1x128xf32> -> vector<1x128xf32>
    %7 = arith.addf %4, %6 : vector<1x128xf32>
    %c0_9 = arith.constant 0 : index
    %c0_10 = arith.constant 0 : index
    %8 = vector.load %arg5[%c0_9, %c0_10] : memref<1x128xf32, #tpu.memory_space<vmem>>, vector<1x128xf32>
    %9 = arith.addf %7, %8 : vector<1x128xf32>
    %10 = arith.negf %9 : vector<1x128xf32>
    %11 = math.exp %10 : vector<1x128xf32>
    %cst_11 = arith.constant 1.000000e+00 : f32
    %12 = vector.broadcast %cst_11 : f32 to vector<1x128xf32>
    %13 = arith.addf %12, %11 : vector<1x128xf32>
    %14 = arith.divf %12, %13 : vector<1x128xf32>
    %15 = math.tanh %9 : vector<1x128xf32>
    %16 = vector.extract_strided_slice %14 {offsets = [0, 0], sizes = [1, 32], strides = [1, 1]} : vector<1x128xf32> to vector<1x32xf32>
    %17 = vector.extract_strided_slice %14 {offsets = [0, 32], sizes = [1, 32], strides = [1, 1]} : vector<1x128xf32> to vector<1x32xf32>
    %18 = vector.extract_strided_slice %15 {offsets = [0, 64], sizes = [1, 32], strides = [1, 1]} : vector<1x128xf32> to vector<1x32xf32>
    %19 = vector.extract_strided_slice %14 {offsets = [0, 96], sizes = [1, 32], strides = [1, 1]} : vector<1x128xf32> to vector<1x32xf32>
    %20 = arith.mulf %17, %1 : vector<1x32xf32>
    %21 = arith.mulf %16, %18 : vector<1x32xf32>
    %22 = arith.addf %20, %21 : vector<1x32xf32>
    %23 = math.tanh %22 : vector<1x32xf32>
    %24 = arith.mulf %19, %23 : vector<1x32xf32>
    %c1 = arith.constant 1 : index
    %c0_12 = arith.constant 0 : index
    %25 = vector.load %arg1[%c1, %c0_12] : memref<8x16xf32, #tpu.memory_space<vmem>>, vector<1x16xf32>
    %c0_13 = arith.constant 0 : index
    %c0_14 = arith.constant 0 : index
    %26 = vector.load %arg3[%c0_13, %c0_14] : memref<16x128xf32, #tpu.memory_space<vmem>>, vector<16x128xf32>
    %cst_15 = arith.constant dense<0.000000e+00> : vector<1x128xf32>
    %27 = tpu.matmul %25, %26, %cst_15 {dimension_numbers = #tpu.dot_dimension_numbers<[1], [0], [0], [1], [0, 0, 1, 1], [], []>} : vector<1x16xf32>, vector<16x128xf32>, vector<1x128xf32> -> vector<1x128xf32>
    %c0_16 = arith.constant 0 : index
    %c0_17 = arith.constant 0 : index
    %28 = vector.load %arg4[%c0_16, %c0_17] : memref<32x128xf32, #tpu.memory_space<vmem>>, vector<32x128xf32>
    %cst_18 = arith.constant dense<0.000000e+00> : vector<1x128xf32>
    %29 = tpu.matmul %24, %28, %cst_18 {dimension_numbers = #tpu.dot_dimension_numbers<[1], [0], [0], [1], [0, 0, 1, 1], [], []>} : vector<1x32xf32>, vector<32x128xf32>, vector<1x128xf32> -> vector<1x128xf32>
    %30 = arith.addf %27, %29 : vector<1x128xf32>
    %c0_19 = arith.constant 0 : index
    %c0_20 = arith.constant 0 : index
    %31 = vector.load %arg5[%c0_19, %c0_20] : memref<1x128xf32, #tpu.memory_space<vmem>>, vector<1x128xf32>
    %32 = arith.addf %30, %31 : vector<1x128xf32>
    %33 = arith.negf %32 : vector<1x128xf32>
    %34 = math.exp %33 : vector<1x128xf32>
    %cst_21 = arith.constant 1.000000e+00 : f32
    %35 = vector.broadcast %cst_21 : f32 to vector<1x128xf32>
    %36 = arith.addf %35, %34 : vector<1x128xf32>
    %37 = arith.divf %35, %36 : vector<1x128xf32>
    %38 = math.tanh %32 : vector<1x128xf32>
    %39 = vector.extract_strided_slice %37 {offsets = [0, 0], sizes = [1, 32], strides = [1, 1]} : vector<1x128xf32> to vector<1x32xf32>
    %40 = vector.extract_strided_slice %37 {offsets = [0, 32], sizes = [1, 32], strides = [1, 1]} : vector<1x128xf32> to vector<1x32xf32>
    %41 = vector.extract_strided_slice %38 {offsets = [0, 64], sizes = [1, 32], strides = [1, 1]} : vector<1x128xf32> to vector<1x32xf32>
    %42 = vector.extract_strided_slice %37 {offsets = [0, 96], sizes = [1, 32], strides = [1, 1]} : vector<1x128xf32> to vector<1x32xf32>
    %43 = arith.mulf %40, %22 : vector<1x32xf32>
    %44 = arith.mulf %39, %41 : vector<1x32xf32>
    %45 = arith.addf %43, %44 : vector<1x32xf32>
    %46 = math.tanh %45 : vector<1x32xf32>
    %47 = arith.mulf %42, %46 : vector<1x32xf32>
    %c2 = arith.constant 2 : index
    %c0_22 = arith.constant 0 : index
    %48 = vector.load %arg1[%c2, %c0_22] : memref<8x16xf32, #tpu.memory_space<vmem>>, vector<1x16xf32>
    %c0_23 = arith.constant 0 : index
    %c0_24 = arith.constant 0 : index
    %49 = vector.load %arg3[%c0_23, %c0_24] : memref<16x128xf32, #tpu.memory_space<vmem>>, vector<16x128xf32>
    %cst_25 = arith.constant dense<0.000000e+00> : vector<1x128xf32>
    %50 = tpu.matmul %48, %49, %cst_25 {dimension_numbers = #tpu.dot_dimension_numbers<[1], [0], [0], [1], [0, 0, 1, 1], [], []>} : vector<1x16xf32>, vector<16x128xf32>, vector<1x128xf32> -> vector<1x128xf32>
    %c0_26 = arith.constant 0 : index
    %c0_27 = arith.constant 0 : index
    %51 = vector.load %arg4[%c0_26, %c0_27] : memref<32x128xf32, #tpu.memory_space<vmem>>, vector<32x128xf32>
    %cst_28 = arith.constant dense<0.000000e+00> : vector<1x128xf32>
    %52 = tpu.matmul %47, %51, %cst_28 {dimension_numbers = #tpu.dot_dimension_numbers<[1], [0], [0], [1], [0, 0, 1, 1], [], []>} : vector<1x32xf32>, vector<32x128xf32>, vector<1x128xf32> -> vector<1x128xf32>
    %53 = arith.addf %50, %52 : vector<1x128xf32>
    %c0_29 = arith.constant 0 : index
    %c0_30 = arith.constant 0 : index
    %54 = vector.load %arg5[%c0_29, %c0_30] : memref<1x128xf32, #tpu.memory_space<vmem>>, vector<1x128xf32>
    %55 = arith.addf %53, %54 : vector<1x128xf32>
    %56 = arith.negf %55 : vector<1x128xf32>
    %57 = math.exp %56 : vector<1x128xf32>
    %cst_31 = arith.constant 1.000000e+00 : f32
    %58 = vector.broadcast %cst_31 : f32 to vector<1x128xf32>
    %59 = arith.addf %58, %57 : vector<1x128xf32>
    %60 = arith.divf %58, %59 : vector<1x128xf32>
    %61 = math.tanh %55 : vector<1x128xf32>
    %62 = vector.extract_strided_slice %60 {offsets = [0, 0], sizes = [1, 32], strides = [1, 1]} : vector<1x128xf32> to vector<1x32xf32>
    %63 = vector.extract_strided_slice %60 {offsets = [0, 32], sizes = [1, 32], strides = [1, 1]} : vector<1x128xf32> to vector<1x32xf32>
    %64 = vector.extract_strided_slice %61 {offsets = [0, 64], sizes = [1, 32], strides = [1, 1]} : vector<1x128xf32> to vector<1x32xf32>
    %65 = vector.extract_strided_slice %60 {offsets = [0, 96], sizes = [1, 32], strides = [1, 1]} : vector<1x128xf32> to vector<1x32xf32>
    %66 = arith.mulf %63, %45 : vector<1x32xf32>
    %67 = arith.mulf %62, %64 : vector<1x32xf32>
    %68 = arith.addf %66, %67 : vector<1x32xf32>
    %69 = math.tanh %68 : vector<1x32xf32>
    %70 = arith.mulf %65, %69 : vector<1x32xf32>
    %c3 = arith.constant 3 : index
    %c0_32 = arith.constant 0 : index
    %71 = vector.load %arg1[%c3, %c0_32] : memref<8x16xf32, #tpu.memory_space<vmem>>, vector<1x16xf32>
    %c0_33 = arith.constant 0 : index
    %c0_34 = arith.constant 0 : index
    %72 = vector.load %arg3[%c0_33, %c0_34] : memref<16x128xf32, #tpu.memory_space<vmem>>, vector<16x128xf32>
    %cst_35 = arith.constant dense<0.000000e+00> : vector<1x128xf32>
    %73 = tpu.matmul %71, %72, %cst_35 {dimension_numbers = #tpu.dot_dimension_numbers<[1], [0], [0], [1], [0, 0, 1, 1], [], []>} : vector<1x16xf32>, vector<16x128xf32>, vector<1x128xf32> -> vector<1x128xf32>
    %c0_36 = arith.constant 0 : index
    %c0_37 = arith.constant 0 : index
    %74 = vector.load %arg4[%c0_36, %c0_37] : memref<32x128xf32, #tpu.memory_space<vmem>>, vector<32x128xf32>
    %cst_38 = arith.constant dense<0.000000e+00> : vector<1x128xf32>
    %75 = tpu.matmul %70, %74, %cst_38 {dimension_numbers = #tpu.dot_dimension_numbers<[1], [0], [0], [1], [0, 0, 1, 1], [], []>} : vector<1x32xf32>, vector<32x128xf32>, vector<1x128xf32> -> vector<1x128xf32>
    %76 = arith.addf %73, %75 : vector<1x128xf32>
    %c0_39 = arith.constant 0 : index
    %c0_40 = arith.constant 0 : index
    %77 = vector.load %arg5[%c0_39, %c0_40] : memref<1x128xf32, #tpu.memory_space<vmem>>, vector<1x128xf32>
    %78 = arith.addf %76, %77 : vector<1x128xf32>
    %79 = arith.negf %78 : vector<1x128xf32>
    %80 = math.exp %79 : vector<1x128xf32>
    %cst_41 = arith.constant 1.000000e+00 : f32
    %81 = vector.broadcast %cst_41 : f32 to vector<1x128xf32>
    %82 = arith.addf %81, %80 : vector<1x128xf32>
    %83 = arith.divf %81, %82 : vector<1x128xf32>
    %84 = math.tanh %78 : vector<1x128xf32>
    %85 = vector.extract_strided_slice %83 {offsets = [0, 0], sizes = [1, 32], strides = [1, 1]} : vector<1x128xf32> to vector<1x32xf32>
    %86 = vector.extract_strided_slice %83 {offsets = [0, 32], sizes = [1, 32], strides = [1, 1]} : vector<1x128xf32> to vector<1x32xf32>
    %87 = vector.extract_strided_slice %84 {offsets = [0, 64], sizes = [1, 32], strides = [1, 1]} : vector<1x128xf32> to vector<1x32xf32>
    %88 = vector.extract_strided_slice %83 {offsets = [0, 96], sizes = [1, 32], strides = [1, 1]} : vector<1x128xf32> to vector<1x32xf32>
    %89 = arith.mulf %86, %68 : vector<1x32xf32>
    %90 = arith.mulf %85, %87 : vector<1x32xf32>
    %91 = arith.addf %89, %90 : vector<1x32xf32>
    %92 = math.tanh %91 : vector<1x32xf32>
    %93 = arith.mulf %88, %92 : vector<1x32xf32>
    %c4 = arith.constant 4 : index
    %c0_42 = arith.constant 0 : index
    %94 = vector.load %arg1[%c4, %c0_42] : memref<8x16xf32, #tpu.memory_space<vmem>>, vector<1x16xf32>
    %c0_43 = arith.constant 0 : index
    %c0_44 = arith.constant 0 : index
    %95 = vector.load %arg3[%c0_43, %c0_44] : memref<16x128xf32, #tpu.memory_space<vmem>>, vector<16x128xf32>
    %cst_45 = arith.constant dense<0.000000e+00> : vector<1x128xf32>
    %96 = tpu.matmul %94, %95, %cst_45 {dimension_numbers = #tpu.dot_dimension_numbers<[1], [0], [0], [1], [0, 0, 1, 1], [], []>} : vector<1x16xf32>, vector<16x128xf32>, vector<1x128xf32> -> vector<1x128xf32>
    %c0_46 = arith.constant 0 : index
    %c0_47 = arith.constant 0 : index
    %97 = vector.load %arg4[%c0_46, %c0_47] : memref<32x128xf32, #tpu.memory_space<vmem>>, vector<32x128xf32>
    %cst_48 = arith.constant dense<0.000000e+00> : vector<1x128xf32>
    %98 = tpu.matmul %93, %97, %cst_48 {dimension_numbers = #tpu.dot_dimension_numbers<[1], [0], [0], [1], [0, 0, 1, 1], [], []>} : vector<1x32xf32>, vector<32x128xf32>, vector<1x128xf32> -> vector<1x128xf32>
    %99 = arith.addf %96, %98 : vector<1x128xf32>
    %c0_49 = arith.constant 0 : index
    %c0_50 = arith.constant 0 : index
    %100 = vector.load %arg5[%c0_49, %c0_50] : memref<1x128xf32, #tpu.memory_space<vmem>>, vector<1x128xf32>
    %101 = arith.addf %99, %100 : vector<1x128xf32>
    %102 = arith.negf %101 : vector<1x128xf32>
    %103 = math.exp %102 : vector<1x128xf32>
    %cst_51 = arith.constant 1.000000e+00 : f32
    %104 = vector.broadcast %cst_51 : f32 to vector<1x128xf32>
    %105 = arith.addf %104, %103 : vector<1x128xf32>
    %106 = arith.divf %104, %105 : vector<1x128xf32>
    %107 = math.tanh %101 : vector<1x128xf32>
    %108 = vector.extract_strided_slice %106 {offsets = [0, 0], sizes = [1, 32], strides = [1, 1]} : vector<1x128xf32> to vector<1x32xf32>
    %109 = vector.extract_strided_slice %106 {offsets = [0, 32], sizes = [1, 32], strides = [1, 1]} : vector<1x128xf32> to vector<1x32xf32>
    %110 = vector.extract_strided_slice %107 {offsets = [0, 64], sizes = [1, 32], strides = [1, 1]} : vector<1x128xf32> to vector<1x32xf32>
    %111 = vector.extract_strided_slice %106 {offsets = [0, 96], sizes = [1, 32], strides = [1, 1]} : vector<1x128xf32> to vector<1x32xf32>
    %112 = arith.mulf %109, %91 : vector<1x32xf32>
    %113 = arith.mulf %108, %110 : vector<1x32xf32>
    %114 = arith.addf %112, %113 : vector<1x32xf32>
    %115 = math.tanh %114 : vector<1x32xf32>
    %116 = arith.mulf %111, %115 : vector<1x32xf32>
    %c5 = arith.constant 5 : index
    %c0_52 = arith.constant 0 : index
    %117 = vector.load %arg1[%c5, %c0_52] : memref<8x16xf32, #tpu.memory_space<vmem>>, vector<1x16xf32>
    %c0_53 = arith.constant 0 : index
    %c0_54 = arith.constant 0 : index
    %118 = vector.load %arg3[%c0_53, %c0_54] : memref<16x128xf32, #tpu.memory_space<vmem>>, vector<16x128xf32>
    %cst_55 = arith.constant dense<0.000000e+00> : vector<1x128xf32>
    %119 = tpu.matmul %117, %118, %cst_55 {dimension_numbers = #tpu.dot_dimension_numbers<[1], [0], [0], [1], [0, 0, 1, 1], [], []>} : vector<1x16xf32>, vector<16x128xf32>, vector<1x128xf32> -> vector<1x128xf32>
    %c0_56 = arith.constant 0 : index
    %c0_57 = arith.constant 0 : index
    %120 = vector.load %arg4[%c0_56, %c0_57] : memref<32x128xf32, #tpu.memory_space<vmem>>, vector<32x128xf32>
    %cst_58 = arith.constant dense<0.000000e+00> : vector<1x128xf32>
    %121 = tpu.matmul %116, %120, %cst_58 {dimension_numbers = #tpu.dot_dimension_numbers<[1], [0], [0], [1], [0, 0, 1, 1], [], []>} : vector<1x32xf32>, vector<32x128xf32>, vector<1x128xf32> -> vector<1x128xf32>
    %122 = arith.addf %119, %121 : vector<1x128xf32>
    %c0_59 = arith.constant 0 : index
    %c0_60 = arith.constant 0 : index
    %123 = vector.load %arg5[%c0_59, %c0_60] : memref<1x128xf32, #tpu.memory_space<vmem>>, vector<1x128xf32>
    %124 = arith.addf %122, %123 : vector<1x128xf32>
    %125 = arith.negf %124 : vector<1x128xf32>
    %126 = math.exp %125 : vector<1x128xf32>
    %cst_61 = arith.constant 1.000000e+00 : f32
    %127 = vector.broadcast %cst_61 : f32 to vector<1x128xf32>
    %128 = arith.addf %127, %126 : vector<1x128xf32>
    %129 = arith.divf %127, %128 : vector<1x128xf32>
    %130 = math.tanh %124 : vector<1x128xf32>
    %131 = vector.extract_strided_slice %129 {offsets = [0, 0], sizes = [1, 32], strides = [1, 1]} : vector<1x128xf32> to vector<1x32xf32>
    %132 = vector.extract_strided_slice %129 {offsets = [0, 32], sizes = [1, 32], strides = [1, 1]} : vector<1x128xf32> to vector<1x32xf32>
    %133 = vector.extract_strided_slice %130 {offsets = [0, 64], sizes = [1, 32], strides = [1, 1]} : vector<1x128xf32> to vector<1x32xf32>
    %134 = vector.extract_strided_slice %129 {offsets = [0, 96], sizes = [1, 32], strides = [1, 1]} : vector<1x128xf32> to vector<1x32xf32>
    %135 = arith.mulf %132, %114 : vector<1x32xf32>
    %136 = arith.mulf %131, %133 : vector<1x32xf32>
    %137 = arith.addf %135, %136 : vector<1x32xf32>
    %138 = math.tanh %137 : vector<1x32xf32>
    %139 = arith.mulf %134, %138 : vector<1x32xf32>
    %c6 = arith.constant 6 : index
    %c0_62 = arith.constant 0 : index
    %140 = vector.load %arg1[%c6, %c0_62] : memref<8x16xf32, #tpu.memory_space<vmem>>, vector<1x16xf32>
    %c0_63 = arith.constant 0 : index
    %c0_64 = arith.constant 0 : index
    %141 = vector.load %arg3[%c0_63, %c0_64] : memref<16x128xf32, #tpu.memory_space<vmem>>, vector<16x128xf32>
    %cst_65 = arith.constant dense<0.000000e+00> : vector<1x128xf32>
    %142 = tpu.matmul %140, %141, %cst_65 {dimension_numbers = #tpu.dot_dimension_numbers<[1], [0], [0], [1], [0, 0, 1, 1], [], []>} : vector<1x16xf32>, vector<16x128xf32>, vector<1x128xf32> -> vector<1x128xf32>
    %c0_66 = arith.constant 0 : index
    %c0_67 = arith.constant 0 : index
    %143 = vector.load %arg4[%c0_66, %c0_67] : memref<32x128xf32, #tpu.memory_space<vmem>>, vector<32x128xf32>
    %cst_68 = arith.constant dense<0.000000e+00> : vector<1x128xf32>
    %144 = tpu.matmul %139, %143, %cst_68 {dimension_numbers = #tpu.dot_dimension_numbers<[1], [0], [0], [1], [0, 0, 1, 1], [], []>} : vector<1x32xf32>, vector<32x128xf32>, vector<1x128xf32> -> vector<1x128xf32>
    %145 = arith.addf %142, %144 : vector<1x128xf32>
    %c0_69 = arith.constant 0 : index
    %c0_70 = arith.constant 0 : index
    %146 = vector.load %arg5[%c0_69, %c0_70] : memref<1x128xf32, #tpu.memory_space<vmem>>, vector<1x128xf32>
    %147 = arith.addf %145, %146 : vector<1x128xf32>
    %148 = arith.negf %147 : vector<1x128xf32>
    %149 = math.exp %148 : vector<1x128xf32>
    %cst_71 = arith.constant 1.000000e+00 : f32
    %150 = vector.broadcast %cst_71 : f32 to vector<1x128xf32>
    %151 = arith.addf %150, %149 : vector<1x128xf32>
    %152 = arith.divf %150, %151 : vector<1x128xf32>
    %153 = math.tanh %147 : vector<1x128xf32>
    %154 = vector.extract_strided_slice %152 {offsets = [0, 0], sizes = [1, 32], strides = [1, 1]} : vector<1x128xf32> to vector<1x32xf32>
    %155 = vector.extract_strided_slice %152 {offsets = [0, 32], sizes = [1, 32], strides = [1, 1]} : vector<1x128xf32> to vector<1x32xf32>
    %156 = vector.extract_strided_slice %153 {offsets = [0, 64], sizes = [1, 32], strides = [1, 1]} : vector<1x128xf32> to vector<1x32xf32>
    %157 = vector.extract_strided_slice %152 {offsets = [0, 96], sizes = [1, 32], strides = [1, 1]} : vector<1x128xf32> to vector<1x32xf32>
    %158 = arith.mulf %155, %137 : vector<1x32xf32>
    %159 = arith.mulf %154, %156 : vector<1x32xf32>
    %160 = arith.addf %158, %159 : vector<1x32xf32>
    %161 = math.tanh %160 : vector<1x32xf32>
    %162 = arith.mulf %157, %161 : vector<1x32xf32>
    %c7 = arith.constant 7 : index
    %c0_72 = arith.constant 0 : index
    %163 = vector.load %arg1[%c7, %c0_72] : memref<8x16xf32, #tpu.memory_space<vmem>>, vector<1x16xf32>
    %c0_73 = arith.constant 0 : index
    %c0_74 = arith.constant 0 : index
    %164 = vector.load %arg3[%c0_73, %c0_74] : memref<16x128xf32, #tpu.memory_space<vmem>>, vector<16x128xf32>
    %cst_75 = arith.constant dense<0.000000e+00> : vector<1x128xf32>
    %165 = tpu.matmul %163, %164, %cst_75 {dimension_numbers = #tpu.dot_dimension_numbers<[1], [0], [0], [1], [0, 0, 1, 1], [], []>} : vector<1x16xf32>, vector<16x128xf32>, vector<1x128xf32> -> vector<1x128xf32>
    %c0_76 = arith.constant 0 : index
    %c0_77 = arith.constant 0 : index
    %166 = vector.load %arg4[%c0_76, %c0_77] : memref<32x128xf32, #tpu.memory_space<vmem>>, vector<32x128xf32>
    %cst_78 = arith.constant dense<0.000000e+00> : vector<1x128xf32>
    %167 = tpu.matmul %162, %166, %cst_78 {dimension_numbers = #tpu.dot_dimension_numbers<[1], [0], [0], [1], [0, 0, 1, 1], [], []>} : vector<1x32xf32>, vector<32x128xf32>, vector<1x128xf32> -> vector<1x128xf32>
    %168 = arith.addf %165, %167 : vector<1x128xf32>
    %c0_79 = arith.constant 0 : index
    %c0_80 = arith.constant 0 : index
    %169 = vector.load %arg5[%c0_79, %c0_80] : memref<1x128xf32, #tpu.memory_space<vmem>>, vector<1x128xf32>
    %170 = arith.addf %168, %169 : vector<1x128xf32>
    %171 = arith.negf %170 : vector<1x128xf32>
    %172 = math.exp %171 : vector<1x128xf32>
    %cst_81 = arith.constant 1.000000e+00 : f32
    %173 = vector.broadcast %cst_81 : f32 to vector<1x128xf32>
    %174 = arith.addf %173, %172 : vector<1x128xf32>
    %175 = arith.divf %173, %174 : vector<1x128xf32>
    %176 = math.tanh %170 : vector<1x128xf32>
    %177 = vector.extract_strided_slice %175 {offsets = [0, 0], sizes = [1, 32], strides = [1, 1]} : vector<1x128xf32> to vector<1x32xf32>
    %178 = vector.extract_strided_slice %175 {offsets = [0, 32], sizes = [1, 32], strides = [1, 1]} : vector<1x128xf32> to vector<1x32xf32>
    %179 = vector.extract_strided_slice %176 {offsets = [0, 64], sizes = [1, 32], strides = [1, 1]} : vector<1x128xf32> to vector<1x32xf32>
    %180 = vector.extract_strided_slice %175 {offsets = [0, 96], sizes = [1, 32], strides = [1, 1]} : vector<1x128xf32> to vector<1x32xf32>
    %181 = arith.mulf %178, %160 : vector<1x32xf32>
    %182 = arith.mulf %177, %179 : vector<1x32xf32>
    %183 = arith.addf %181, %182 : vector<1x32xf32>
    %184 = math.tanh %183 : vector<1x32xf32>
    %185 = arith.mulf %180, %184 : vector<1x32xf32>
    %c0_82 = arith.constant 0 : index
    %c0_83 = arith.constant 0 : index
    %186 = vector.load %arg6[%c0_82, %c0_83] : memref<32x32xf32, #tpu.memory_space<vmem>>, vector<32x32xf32>
    %cst_84 = arith.constant dense<0.000000e+00> : vector<1x32xf32>
    %187 = tpu.matmul %185, %186, %cst_84 {dimension_numbers = #tpu.dot_dimension_numbers<[1], [0], [0], [1], [0, 0, 1, 1], [], []>} : vector<1x32xf32>, vector<32x32xf32>, vector<1x32xf32> -> vector<1x32xf32>
    %c0_85 = arith.constant 0 : index
    %c0_86 = arith.constant 0 : index
    %188 = vector.load %arg7[%c0_85, %c0_86] : memref<1x32xf32, #tpu.memory_space<vmem>>, vector<1x32xf32>
    %189 = arith.addf %187, %188 : vector<1x32xf32>
    %c0_87 = arith.constant 0 : index
    %c0_88 = arith.constant 0 : index
    %190 = vector.load %arg21[%c0_87, %c0_88] : memref<1x32xf32, #tpu.memory_space<vmem>>, vector<1x32xf32>
    tpu.vector_store %arg21[%c0_87, %c0_88], %189 {strides = array<i32>} : memref<1x32xf32, #tpu.memory_space<vmem>>, vector<1x32xf32>,
    %191 = vector.extract_strided_slice %189 {offsets = [0, 0], sizes = [1, 16], strides = [1, 1]} : vector<1x32xf32> to vector<1x16xf32>
    %192 = vector.extract_strided_slice %189 {offsets = [0, 16], sizes = [1, 16], strides = [1, 1]} : vector<1x32xf32> to vector<1x16xf32>
    %c0_89 = arith.constant 0 : index
    %c0_90 = arith.constant 0 : index
    %193 = vector.load %arg8[%c0_89, %c0_90] : memref<1x16xf32, #tpu.memory_space<vmem>>, vector<1x16xf32>
    %cst_91 = arith.constant 5.000000e-01 : f32
    %194 = vector.broadcast %cst_91 : f32 to vector<1x16xf32>
    %195 = arith.mulf %192, %194 : vector<1x16xf32>
    %196 = math.exp %195 : vector<1x16xf32>
    %197 = arith.mulf %193, %196 : vector<1x16xf32>
    %198 = arith.addf %197, %191 : vector<1x16xf32>
    %c0_92 = arith.constant 0 : index
    %c0_93 = arith.constant 0 : index
    %199 = vector.load %arg10[%c0_92, %c0_93] : memref<16x32xf32, #tpu.memory_space<vmem>>, vector<16x32xf32>
    %cst_94 = arith.constant dense<0.000000e+00> : vector<1x32xf32>
    %200 = tpu.matmul %198, %199, %cst_94 {dimension_numbers = #tpu.dot_dimension_numbers<[1], [0], [0], [1], [0, 0, 1, 1], [], []>} : vector<1x16xf32>, vector<16x32xf32>, vector<1x32xf32> -> vector<1x32xf32>
    %c0_95 = arith.constant 0 : index
    %c0_96 = arith.constant 0 : index
    %201 = vector.load %arg9[%c0_95, %c0_96] : memref<1x8xf32, #tpu.memory_space<vmem>>, vector<1x8xf32>
    %c0_97 = arith.constant 0 : index
    %c0_98 = arith.constant 0 : index
    %202 = vector.load %arg11[%c0_97, %c0_98] : memref<8x32xf32, #tpu.memory_space<vmem>>, vector<8x32xf32>
    %cst_99 = arith.constant dense<0.000000e+00> : vector<1x32xf32>
    %203 = tpu.matmul %201, %202, %cst_99 {dimension_numbers = #tpu.dot_dimension_numbers<[1], [0], [0], [1], [0, 0, 1, 1], [], []>} : vector<1x8xf32>, vector<8x32xf32>, vector<1x32xf32> -> vector<1x32xf32>
    %204 = arith.addf %200, %203 : vector<1x32xf32>
    %c0_100 = arith.constant 0 : index
    %c0_101 = arith.constant 0 : index
    %205 = vector.load %arg12[%c0_100, %c0_101] : memref<1x32xf32, #tpu.memory_space<vmem>>, vector<1x32xf32>
    %206 = arith.addf %204, %205 : vector<1x32xf32>
    %cst_102 = arith.constant 0.000000e+00 : f32
    %207 = vector.broadcast %cst_102 : f32 to vector<1x32xf32>
    %cst_103 = arith.constant 0.000000e+00 : f32
    %208 = vector.broadcast %cst_103 : f32 to vector<8x128xf32>
    %c0_104 = arith.constant 0 : index
    %c0_105 = arith.constant 0 : index
    %209 = vector.load %arg20[%c0_104, %c0_105] : memref<8x128xf32, #tpu.memory_space<vmem>>, vector<8x128xf32>
    tpu.vector_store %arg20[%c0_104, %c0_105], %208 {strides = array<i32>} : memref<8x128xf32, #tpu.memory_space<vmem>>, vector<8x128xf32>,
    %c0_106 = arith.constant 0 : index
    %c0_107 = arith.constant 0 : index
    %210 = vector.load %arg18[%c0_106, %c0_107] : memref<8x16xf32, #tpu.memory_space<vmem>>, vector<1x16xf32>
    %c0_108 = arith.constant 0 : index
    %c0_109 = arith.constant 0 : index
    %211 = vector.load %arg13[%c0_108, %c0_109] : memref<16x128xf32, #tpu.memory_space<vmem>>, vector<16x128xf32>
    %cst_110 = arith.constant dense<0.000000e+00> : vector<1x128xf32>
    %212 = tpu.matmul %210, %211, %cst_110 {dimension_numbers = #tpu.dot_dimension_numbers<[1], [0], [0], [1], [0, 0, 1, 1], [], []>} : vector<1x16xf32>, vector<16x128xf32>, vector<1x128xf32> -> vector<1x128xf32>
    %c0_111 = arith.constant 0 : index
    %c0_112 = arith.constant 0 : index
    %213 = vector.load %arg14[%c0_111, %c0_112] : memref<32x128xf32, #tpu.memory_space<vmem>>, vector<32x128xf32>
    %cst_113 = arith.constant dense<0.000000e+00> : vector<1x128xf32>
    %214 = tpu.matmul %206, %213, %cst_113 {dimension_numbers = #tpu.dot_dimension_numbers<[1], [0], [0], [1], [0, 0, 1, 1], [], []>} : vector<1x32xf32>, vector<32x128xf32>, vector<1x128xf32> -> vector<1x128xf32>
    %215 = arith.addf %212, %214 : vector<1x128xf32>
    %c0_114 = arith.constant 0 : index
    %c0_115 = arith.constant 0 : index
    %216 = vector.load %arg15[%c0_114, %c0_115] : memref<1x128xf32, #tpu.memory_space<vmem>>, vector<1x128xf32>
    %217 = arith.addf %215, %216 : vector<1x128xf32>
    %218 = arith.negf %217 : vector<1x128xf32>
    %219 = math.exp %218 : vector<1x128xf32>
    %cst_116 = arith.constant 1.000000e+00 : f32
    %220 = vector.broadcast %cst_116 : f32 to vector<1x128xf32>
    %221 = arith.addf %220, %219 : vector<1x128xf32>
    %222 = arith.divf %220, %221 : vector<1x128xf32>
    %223 = math.tanh %217 : vector<1x128xf32>
    %224 = vector.extract_strided_slice %222 {offsets = [0, 0], sizes = [1, 32], strides = [1, 1]} : vector<1x128xf32> to vector<1x32xf32>
    %225 = vector.extract_strided_slice %222 {offsets = [0, 32], sizes = [1, 32], strides = [1, 1]} : vector<1x128xf32> to vector<1x32xf32>
    %226 = vector.extract_strided_slice %223 {offsets = [0, 64], sizes = [1, 32], strides = [1, 1]} : vector<1x128xf32> to vector<1x32xf32>
    %227 = vector.extract_strided_slice %222 {offsets = [0, 96], sizes = [1, 32], strides = [1, 1]} : vector<1x128xf32> to vector<1x32xf32>
    %228 = arith.mulf %225, %207 : vector<1x32xf32>
    %229 = arith.mulf %224, %226 : vector<1x32xf32>
    %230 = arith.addf %228, %229 : vector<1x32xf32>
    %231 = math.tanh %230 : vector<1x32xf32>
    %232 = arith.mulf %227, %231 : vector<1x32xf32>
    %c0_117 = arith.constant 0 : index
    %c0_118 = arith.constant 0 : index
    %233 = vector.load %arg16[%c0_117, %c0_118] : memref<32x128xf32, #tpu.memory_space<vmem>>, vector<32x128xf32>
    %cst_119 = arith.constant dense<0.000000e+00> : vector<1x128xf32>
    %234 = tpu.matmul %232, %233, %cst_119 {dimension_numbers = #tpu.dot_dimension_numbers<[1], [0], [0], [1], [0, 0, 1, 1], [], []>} : vector<1x32xf32>, vector<32x128xf32>, vector<1x128xf32> -> vector<1x128xf32>
    %c0_120 = arith.constant 0 : index
    %c0_121 = arith.constant 0 : index
    %235 = vector.load %arg17[%c0_120, %c0_121] : memref<1x128xf32, #tpu.memory_space<vmem>>, vector<1x128xf32>
    %236 = arith.addf %234, %235 : vector<1x128xf32>
    %c1_122 = arith.constant 1 : index
    %c0_123 = arith.constant 0 : index
    %237 = vector.load %arg20[%c1_122, %c0_123] : memref<8x128xf32, #tpu.memory_space<vmem>>, vector<1x128xf32>
    tpu.vector_store %arg20[%c1_122, %c0_123], %236 {strides = array<i32>} : memref<8x128xf32, #tpu.memory_space<vmem>>, vector<1x128xf32>,
    %c1_124 = arith.constant 1 : index
    %c0_125 = arith.constant 0 : index
    %238 = vector.load %arg18[%c1_124, %c0_125] : memref<8x16xf32, #tpu.memory_space<vmem>>, vector<1x16xf32>
    %c0_126 = arith.constant 0 : index
    %c0_127 = arith.constant 0 : index
    %239 = vector.load %arg13[%c0_126, %c0_127] : memref<16x128xf32, #tpu.memory_space<vmem>>, vector<16x128xf32>
    %cst_128 = arith.constant dense<0.000000e+00> : vector<1x128xf32>
    %240 = tpu.matmul %238, %239, %cst_128 {dimension_numbers = #tpu.dot_dimension_numbers<[1], [0], [0], [1], [0, 0, 1, 1], [], []>} : vector<1x16xf32>, vector<16x128xf32>, vector<1x128xf32> -> vector<1x128xf32>
    %c0_129 = arith.constant 0 : index
    %c0_130 = arith.constant 0 : index
    %241 = vector.load %arg14[%c0_129, %c0_130] : memref<32x128xf32, #tpu.memory_space<vmem>>, vector<32x128xf32>
    %cst_131 = arith.constant dense<0.000000e+00> : vector<1x128xf32>
    %242 = tpu.matmul %232, %241, %cst_131 {dimension_numbers = #tpu.dot_dimension_numbers<[1], [0], [0], [1], [0, 0, 1, 1], [], []>} : vector<1x32xf32>, vector<32x128xf32>, vector<1x128xf32> -> vector<1x128xf32>
    %243 = arith.addf %240, %242 : vector<1x128xf32>
    %c0_132 = arith.constant 0 : index
    %c0_133 = arith.constant 0 : index
    %244 = vector.load %arg15[%c0_132, %c0_133] : memref<1x128xf32, #tpu.memory_space<vmem>>, vector<1x128xf32>
    %245 = arith.addf %243, %244 : vector<1x128xf32>
    %246 = arith.negf %245 : vector<1x128xf32>
    %247 = math.exp %246 : vector<1x128xf32>
    %cst_134 = arith.constant 1.000000e+00 : f32
    %248 = vector.broadcast %cst_134 : f32 to vector<1x128xf32>
    %249 = arith.addf %248, %247 : vector<1x128xf32>
    %250 = arith.divf %248, %249 : vector<1x128xf32>
    %251 = math.tanh %245 : vector<1x128xf32>
    %252 = vector.extract_strided_slice %250 {offsets = [0, 0], sizes = [1, 32], strides = [1, 1]} : vector<1x128xf32> to vector<1x32xf32>
    %253 = vector.extract_strided_slice %250 {offsets = [0, 32], sizes = [1, 32], strides = [1, 1]} : vector<1x128xf32> to vector<1x32xf32>
    %254 = vector.extract_strided_slice %251 {offsets = [0, 64], sizes = [1, 32], strides = [1, 1]} : vector<1x128xf32> to vector<1x32xf32>
    %255 = vector.extract_strided_slice %250 {offsets = [0, 96], sizes = [1, 32], strides = [1, 1]} : vector<1x128xf32> to vector<1x32xf32>
    %256 = arith.mulf %253, %230 : vector<1x32xf32>
    %257 = arith.mulf %252, %254 : vector<1x32xf32>
    %258 = arith.addf %256, %257 : vector<1x32xf32>
    %259 = math.tanh %258 : vector<1x32xf32>
    %260 = arith.mulf %255, %259 : vector<1x32xf32>
    %c0_135 = arith.constant 0 : index
    %c0_136 = arith.constant 0 : index
    %261 = vector.load %arg16[%c0_135, %c0_136] : memref<32x128xf32, #tpu.memory_space<vmem>>, vector<32x128xf32>
    %cst_137 = arith.constant dense<0.000000e+00> : vector<1x128xf32>
    %262 = tpu.matmul %260, %261, %cst_137 {dimension_numbers = #tpu.dot_dimension_numbers<[1], [0], [0], [1], [0, 0, 1, 1], [], []>} : vector<1x32xf32>, vector<32x128xf32>, vector<1x128xf32> -> vector<1x128xf32>
    %c0_138 = arith.constant 0 : index
    %c0_139 = arith.constant 0 : index
    %263 = vector.load %arg17[%c0_138, %c0_139] : memref<1x128xf32, #tpu.memory_space<vmem>>, vector<1x128xf32>
    %264 = arith.addf %262, %263 : vector<1x128xf32>
    %c2_140 = arith.constant 2 : index
    %c0_141 = arith.constant 0 : index
    %265 = vector.load %arg20[%c2_140, %c0_141] : memref<8x128xf32, #tpu.memory_space<vmem>>, vector<1x128xf32>
    tpu.vector_store %arg20[%c2_140, %c0_141], %264 {strides = array<i32>} : memref<8x128xf32, #tpu.memory_space<vmem>>, vector<1x128xf32>,
    %c2_142 = arith.constant 2 : index
    %c0_143 = arith.constant 0 : index
    %266 = vector.load %arg18[%c2_142, %c0_143] : memref<8x16xf32, #tpu.memory_space<vmem>>, vector<1x16xf32>
    %c0_144 = arith.constant 0 : index
    %c0_145 = arith.constant 0 : index
    %267 = vector.load %arg13[%c0_144, %c0_145] : memref<16x128xf32, #tpu.memory_space<vmem>>, vector<16x128xf32>
    %cst_146 = arith.constant dense<0.000000e+00> : vector<1x128xf32>
    %268 = tpu.matmul %266, %267, %cst_146 {dimension_numbers = #tpu.dot_dimension_numbers<[1], [0], [0], [1], [0, 0, 1, 1], [], []>} : vector<1x16xf32>, vector<16x128xf32>, vector<1x128xf32> -> vector<1x128xf32>
    %c0_147 = arith.constant 0 : index
    %c0_148 = arith.constant 0 : index
    %269 = vector.load %arg14[%c0_147, %c0_148] : memref<32x128xf32, #tpu.memory_space<vmem>>, vector<32x128xf32>
    %cst_149 = arith.constant dense<0.000000e+00> : vector<1x128xf32>
    %270 = tpu.matmul %260, %269, %cst_149 {dimension_numbers = #tpu.dot_dimension_numbers<[1], [0], [0], [1], [0, 0, 1, 1], [], []>} : vector<1x32xf32>, vector<32x128xf32>, vector<1x128xf32> -> vector<1x128xf32>
    %271 = arith.addf %268, %270 : vector<1x128xf32>
    %c0_150 = arith.constant 0 : index
    %c0_151 = arith.constant 0 : index
    %272 = vector.load %arg15[%c0_150, %c0_151] : memref<1x128xf32, #tpu.memory_space<vmem>>, vector<1x128xf32>
    %273 = arith.addf %271, %272 : vector<1x128xf32>
    %274 = arith.negf %273 : vector<1x128xf32>
    %275 = math.exp %274 : vector<1x128xf32>
    %cst_152 = arith.constant 1.000000e+00 : f32
    %276 = vector.broadcast %cst_152 : f32 to vector<1x128xf32>
    %277 = arith.addf %276, %275 : vector<1x128xf32>
    %278 = arith.divf %276, %277 : vector<1x128xf32>
    %279 = math.tanh %273 : vector<1x128xf32>
    %280 = vector.extract_strided_slice %278 {offsets = [0, 0], sizes = [1, 32], strides = [1, 1]} : vector<1x128xf32> to vector<1x32xf32>
    %281 = vector.extract_strided_slice %278 {offsets = [0, 32], sizes = [1, 32], strides = [1, 1]} : vector<1x128xf32> to vector<1x32xf32>
    %282 = vector.extract_strided_slice %279 {offsets = [0, 64], sizes = [1, 32], strides = [1, 1]} : vector<1x128xf32> to vector<1x32xf32>
    %283 = vector.extract_strided_slice %278 {offsets = [0, 96], sizes = [1, 32], strides = [1, 1]} : vector<1x128xf32> to vector<1x32xf32>
    %284 = arith.mulf %281, %258 : vector<1x32xf32>
    %285 = arith.mulf %280, %282 : vector<1x32xf32>
    %286 = arith.addf %284, %285 : vector<1x32xf32>
    %287 = math.tanh %286 : vector<1x32xf32>
    %288 = arith.mulf %283, %287 : vector<1x32xf32>
    %c0_153 = arith.constant 0 : index
    %c0_154 = arith.constant 0 : index
    %289 = vector.load %arg16[%c0_153, %c0_154] : memref<32x128xf32, #tpu.memory_space<vmem>>, vector<32x128xf32>
    %cst_155 = arith.constant dense<0.000000e+00> : vector<1x128xf32>
    %290 = tpu.matmul %288, %289, %cst_155 {dimension_numbers = #tpu.dot_dimension_numbers<[1], [0], [0], [1], [0, 0, 1, 1], [], []>} : vector<1x32xf32>, vector<32x128xf32>, vector<1x128xf32> -> vector<1x128xf32>
    %c0_156 = arith.constant 0 : index
    %c0_157 = arith.constant 0 : index
    %291 = vector.load %arg17[%c0_156, %c0_157] : memref<1x128xf32, #tpu.memory_space<vmem>>, vector<1x128xf32>
    %292 = arith.addf %290, %291 : vector<1x128xf32>
    %c3_158 = arith.constant 3 : index
    %c0_159 = arith.constant 0 : index
    %293 = vector.load %arg20[%c3_158, %c0_159] : memref<8x128xf32, #tpu.memory_space<vmem>>, vector<1x128xf32>
    tpu.vector_store %arg20[%c3_158, %c0_159], %292 {strides = array<i32>} : memref<8x128xf32, #tpu.memory_space<vmem>>, vector<1x128xf32>,
    %c3_160 = arith.constant 3 : index
    %c0_161 = arith.constant 0 : index
    %294 = vector.load %arg18[%c3_160, %c0_161] : memref<8x16xf32, #tpu.memory_space<vmem>>, vector<1x16xf32>
    %c0_162 = arith.constant 0 : index
    %c0_163 = arith.constant 0 : index
    %295 = vector.load %arg13[%c0_162, %c0_163] : memref<16x128xf32, #tpu.memory_space<vmem>>, vector<16x128xf32>
    %cst_164 = arith.constant dense<0.000000e+00> : vector<1x128xf32>
    %296 = tpu.matmul %294, %295, %cst_164 {dimension_numbers = #tpu.dot_dimension_numbers<[1], [0], [0], [1], [0, 0, 1, 1], [], []>} : vector<1x16xf32>, vector<16x128xf32>, vector<1x128xf32> -> vector<1x128xf32>
    %c0_165 = arith.constant 0 : index
    %c0_166 = arith.constant 0 : index
    %297 = vector.load %arg14[%c0_165, %c0_166] : memref<32x128xf32, #tpu.memory_space<vmem>>, vector<32x128xf32>
    %cst_167 = arith.constant dense<0.000000e+00> : vector<1x128xf32>
    %298 = tpu.matmul %288, %297, %cst_167 {dimension_numbers = #tpu.dot_dimension_numbers<[1], [0], [0], [1], [0, 0, 1, 1], [], []>} : vector<1x32xf32>, vector<32x128xf32>, vector<1x128xf32> -> vector<1x128xf32>
    %299 = arith.addf %296, %298 : vector<1x128xf32>
    %c0_168 = arith.constant 0 : index
    %c0_169 = arith.constant 0 : index
    %300 = vector.load %arg15[%c0_168, %c0_169] : memref<1x128xf32, #tpu.memory_space<vmem>>, vector<1x128xf32>
    %301 = arith.addf %299, %300 : vector<1x128xf32>
    %302 = arith.negf %301 : vector<1x128xf32>
    %303 = math.exp %302 : vector<1x128xf32>
    %cst_170 = arith.constant 1.000000e+00 : f32
    %304 = vector.broadcast %cst_170 : f32 to vector<1x128xf32>
    %305 = arith.addf %304, %303 : vector<1x128xf32>
    %306 = arith.divf %304, %305 : vector<1x128xf32>
    %307 = math.tanh %301 : vector<1x128xf32>
    %308 = vector.extract_strided_slice %306 {offsets = [0, 0], sizes = [1, 32], strides = [1, 1]} : vector<1x128xf32> to vector<1x32xf32>
    %309 = vector.extract_strided_slice %306 {offsets = [0, 32], sizes = [1, 32], strides = [1, 1]} : vector<1x128xf32> to vector<1x32xf32>
    %310 = vector.extract_strided_slice %307 {offsets = [0, 64], sizes = [1, 32], strides = [1, 1]} : vector<1x128xf32> to vector<1x32xf32>
    %311 = vector.extract_strided_slice %306 {offsets = [0, 96], sizes = [1, 32], strides = [1, 1]} : vector<1x128xf32> to vector<1x32xf32>
    %312 = arith.mulf %309, %286 : vector<1x32xf32>
    %313 = arith.mulf %308, %310 : vector<1x32xf32>
    %314 = arith.addf %312, %313 : vector<1x32xf32>
    %315 = math.tanh %314 : vector<1x32xf32>
    %316 = arith.mulf %311, %315 : vector<1x32xf32>
    %c0_171 = arith.constant 0 : index
    %c0_172 = arith.constant 0 : index
    %317 = vector.load %arg16[%c0_171, %c0_172] : memref<32x128xf32, #tpu.memory_space<vmem>>, vector<32x128xf32>
    %cst_173 = arith.constant dense<0.000000e+00> : vector<1x128xf32>
    %318 = tpu.matmul %316, %317, %cst_173 {dimension_numbers = #tpu.dot_dimension_numbers<[1], [0], [0], [1], [0, 0, 1, 1], [], []>} : vector<1x32xf32>, vector<32x128xf32>, vector<1x128xf32> -> vector<1x128xf32>
    %c0_174 = arith.constant 0 : index
    %c0_175 = arith.constant 0 : index
    %319 = vector.load %arg17[%c0_174, %c0_175] : memref<1x128xf32, #tpu.memory_space<vmem>>, vector<1x128xf32>
    %320 = arith.addf %318, %319 : vector<1x128xf32>
    %c4_176 = arith.constant 4 : index
    %c0_177 = arith.constant 0 : index
    %321 = vector.load %arg20[%c4_176, %c0_177] : memref<8x128xf32, #tpu.memory_space<vmem>>, vector<1x128xf32>
    tpu.vector_store %arg20[%c4_176, %c0_177], %320 {strides = array<i32>} : memref<8x128xf32, #tpu.memory_space<vmem>>, vector<1x128xf32>,
    %c4_178 = arith.constant 4 : index
    %c0_179 = arith.constant 0 : index
    %322 = vector.load %arg18[%c4_178, %c0_179] : memref<8x16xf32, #tpu.memory_space<vmem>>, vector<1x16xf32>
    %c0_180 = arith.constant 0 : index
    %c0_181 = arith.constant 0 : index
    %323 = vector.load %arg13[%c0_180, %c0_181] : memref<16x128xf32, #tpu.memory_space<vmem>>, vector<16x128xf32>
    %cst_182 = arith.constant dense<0.000000e+00> : vector<1x128xf32>
    %324 = tpu.matmul %322, %323, %cst_182 {dimension_numbers = #tpu.dot_dimension_numbers<[1], [0], [0], [1], [0, 0, 1, 1], [], []>} : vector<1x16xf32>, vector<16x128xf32>, vector<1x128xf32> -> vector<1x128xf32>
    %c0_183 = arith.constant 0 : index
    %c0_184 = arith.constant 0 : index
    %325 = vector.load %arg14[%c0_183, %c0_184] : memref<32x128xf32, #tpu.memory_space<vmem>>, vector<32x128xf32>
    %cst_185 = arith.constant dense<0.000000e+00> : vector<1x128xf32>
    %326 = tpu.matmul %316, %325, %cst_185 {dimension_numbers = #tpu.dot_dimension_numbers<[1], [0], [0], [1], [0, 0, 1, 1], [], []>} : vector<1x32xf32>, vector<32x128xf32>, vector<1x128xf32> -> vector<1x128xf32>
    %327 = arith.addf %324, %326 : vector<1x128xf32>
    %c0_186 = arith.constant 0 : index
    %c0_187 = arith.constant 0 : index
    %328 = vector.load %arg15[%c0_186, %c0_187] : memref<1x128xf32, #tpu.memory_space<vmem>>, vector<1x128xf32>
    %329 = arith.addf %327, %328 : vector<1x128xf32>
    %330 = arith.negf %329 : vector<1x128xf32>
    %331 = math.exp %330 : vector<1x128xf32>
    %cst_188 = arith.constant 1.000000e+00 : f32
    %332 = vector.broadcast %cst_188 : f32 to vector<1x128xf32>
    %333 = arith.addf %332, %331 : vector<1x128xf32>
    %334 = arith.divf %332, %333 : vector<1x128xf32>
    %335 = math.tanh %329 : vector<1x128xf32>
    %336 = vector.extract_strided_slice %334 {offsets = [0, 0], sizes = [1, 32], strides = [1, 1]} : vector<1x128xf32> to vector<1x32xf32>
    %337 = vector.extract_strided_slice %334 {offsets = [0, 32], sizes = [1, 32], strides = [1, 1]} : vector<1x128xf32> to vector<1x32xf32>
    %338 = vector.extract_strided_slice %335 {offsets = [0, 64], sizes = [1, 32], strides = [1, 1]} : vector<1x128xf32> to vector<1x32xf32>
    %339 = vector.extract_strided_slice %334 {offsets = [0, 96], sizes = [1, 32], strides = [1, 1]} : vector<1x128xf32> to vector<1x32xf32>
    %340 = arith.mulf %337, %314 : vector<1x32xf32>
    %341 = arith.mulf %336, %338 : vector<1x32xf32>
    %342 = arith.addf %340, %341 : vector<1x32xf32>
    %343 = math.tanh %342 : vector<1x32xf32>
    %344 = arith.mulf %339, %343 : vector<1x32xf32>
    %c0_189 = arith.constant 0 : index
    %c0_190 = arith.constant 0 : index
    %345 = vector.load %arg16[%c0_189, %c0_190] : memref<32x128xf32, #tpu.memory_space<vmem>>, vector<32x128xf32>
    %cst_191 = arith.constant dense<0.000000e+00> : vector<1x128xf32>
    %346 = tpu.matmul %344, %345, %cst_191 {dimension_numbers = #tpu.dot_dimension_numbers<[1], [0], [0], [1], [0, 0, 1, 1], [], []>} : vector<1x32xf32>, vector<32x128xf32>, vector<1x128xf32> -> vector<1x128xf32>
    %c0_192 = arith.constant 0 : index
    %c0_193 = arith.constant 0 : index
    %347 = vector.load %arg17[%c0_192, %c0_193] : memref<1x128xf32, #tpu.memory_space<vmem>>, vector<1x128xf32>
    %348 = arith.addf %346, %347 : vector<1x128xf32>
    %c5_194 = arith.constant 5 : index
    %c0_195 = arith.constant 0 : index
    %349 = vector.load %arg20[%c5_194, %c0_195] : memref<8x128xf32, #tpu.memory_space<vmem>>, vector<1x128xf32>
    tpu.vector_store %arg20[%c5_194, %c0_195], %348 {strides = array<i32>} : memref<8x128xf32, #tpu.memory_space<vmem>>, vector<1x128xf32>,
    %c5_196 = arith.constant 5 : index
    %c0_197 = arith.constant 0 : index
    %350 = vector.load %arg18[%c5_196, %c0_197] : memref<8x16xf32, #tpu.memory_space<vmem>>, vector<1x16xf32>
    %c0_198 = arith.constant 0 : index
    %c0_199 = arith.constant 0 : index
    %351 = vector.load %arg13[%c0_198, %c0_199] : memref<16x128xf32, #tpu.memory_space<vmem>>, vector<16x128xf32>
    %cst_200 = arith.constant dense<0.000000e+00> : vector<1x128xf32>
    %352 = tpu.matmul %350, %351, %cst_200 {dimension_numbers = #tpu.dot_dimension_numbers<[1], [0], [0], [1], [0, 0, 1, 1], [], []>} : vector<1x16xf32>, vector<16x128xf32>, vector<1x128xf32> -> vector<1x128xf32>
    %c0_201 = arith.constant 0 : index
    %c0_202 = arith.constant 0 : index
    %353 = vector.load %arg14[%c0_201, %c0_202] : memref<32x128xf32, #tpu.memory_space<vmem>>, vector<32x128xf32>
    %cst_203 = arith.constant dense<0.000000e+00> : vector<1x128xf32>
    %354 = tpu.matmul %344, %353, %cst_203 {dimension_numbers = #tpu.dot_dimension_numbers<[1], [0], [0], [1], [0, 0, 1, 1], [], []>} : vector<1x32xf32>, vector<32x128xf32>, vector<1x128xf32> -> vector<1x128xf32>
    %355 = arith.addf %352, %354 : vector<1x128xf32>
    %c0_204 = arith.constant 0 : index
    %c0_205 = arith.constant 0 : index
    %356 = vector.load %arg15[%c0_204, %c0_205] : memref<1x128xf32, #tpu.memory_space<vmem>>, vector<1x128xf32>
    %357 = arith.addf %355, %356 : vector<1x128xf32>
    %358 = arith.negf %357 : vector<1x128xf32>
    %359 = math.exp %358 : vector<1x128xf32>
    %cst_206 = arith.constant 1.000000e+00 : f32
    %360 = vector.broadcast %cst_206 : f32 to vector<1x128xf32>
    %361 = arith.addf %360, %359 : vector<1x128xf32>
    %362 = arith.divf %360, %361 : vector<1x128xf32>
    %363 = math.tanh %357 : vector<1x128xf32>
    %364 = vector.extract_strided_slice %362 {offsets = [0, 0], sizes = [1, 32], strides = [1, 1]} : vector<1x128xf32> to vector<1x32xf32>
    %365 = vector.extract_strided_slice %362 {offsets = [0, 32], sizes = [1, 32], strides = [1, 1]} : vector<1x128xf32> to vector<1x32xf32>
    %366 = vector.extract_strided_slice %363 {offsets = [0, 64], sizes = [1, 32], strides = [1, 1]} : vector<1x128xf32> to vector<1x32xf32>
    %367 = vector.extract_strided_slice %362 {offsets = [0, 96], sizes = [1, 32], strides = [1, 1]} : vector<1x128xf32> to vector<1x32xf32>
    %368 = arith.mulf %365, %342 : vector<1x32xf32>
    %369 = arith.mulf %364, %366 : vector<1x32xf32>
    %370 = arith.addf %368, %369 : vector<1x32xf32>
    %371 = math.tanh %370 : vector<1x32xf32>
    %372 = arith.mulf %367, %371 : vector<1x32xf32>
    %c0_207 = arith.constant 0 : index
    %c0_208 = arith.constant 0 : index
    %373 = vector.load %arg16[%c0_207, %c0_208] : memref<32x128xf32, #tpu.memory_space<vmem>>, vector<32x128xf32>
    %cst_209 = arith.constant dense<0.000000e+00> : vector<1x128xf32>
    %374 = tpu.matmul %372, %373, %cst_209 {dimension_numbers = #tpu.dot_dimension_numbers<[1], [0], [0], [1], [0, 0, 1, 1], [], []>} : vector<1x32xf32>, vector<32x128xf32>, vector<1x128xf32> -> vector<1x128xf32>
    %c0_210 = arith.constant 0 : index
    %c0_211 = arith.constant 0 : index
    %375 = vector.load %arg17[%c0_210, %c0_211] : memref<1x128xf32, #tpu.memory_space<vmem>>, vector<1x128xf32>
    %376 = arith.addf %374, %375 : vector<1x128xf32>
    %c6_212 = arith.constant 6 : index
    %c0_213 = arith.constant 0 : index
    %377 = vector.load %arg20[%c6_212, %c0_213] : memref<8x128xf32, #tpu.memory_space<vmem>>, vector<1x128xf32>
    tpu.vector_store %arg20[%c6_212, %c0_213], %376 {strides = array<i32>} : memref<8x128xf32, #tpu.memory_space<vmem>>, vector<1x128xf32>,
    %c6_214 = arith.constant 6 : index
    %c0_215 = arith.constant 0 : index
    %378 = vector.load %arg18[%c6_214, %c0_215] : memref<8x16xf32, #tpu.memory_space<vmem>>, vector<1x16xf32>
    %c0_216 = arith.constant 0 : index
    %c0_217 = arith.constant 0 : index
    %379 = vector.load %arg13[%c0_216, %c0_217] : memref<16x128xf32, #tpu.memory_space<vmem>>, vector<16x128xf32>
    %cst_218 = arith.constant dense<0.000000e+00> : vector<1x128xf32>
    %380 = tpu.matmul %378, %379, %cst_218 {dimension_numbers = #tpu.dot_dimension_numbers<[1], [0], [0], [1], [0, 0, 1, 1], [], []>} : vector<1x16xf32>, vector<16x128xf32>, vector<1x128xf32> -> vector<1x128xf32>
    %c0_219 = arith.constant 0 : index
    %c0_220 = arith.constant 0 : index
    %381 = vector.load %arg14[%c0_219, %c0_220] : memref<32x128xf32, #tpu.memory_space<vmem>>, vector<32x128xf32>
    %cst_221 = arith.constant dense<0.000000e+00> : vector<1x128xf32>
    %382 = tpu.matmul %372, %381, %cst_221 {dimension_numbers = #tpu.dot_dimension_numbers<[1], [0], [0], [1], [0, 0, 1, 1], [], []>} : vector<1x32xf32>, vector<32x128xf32>, vector<1x128xf32> -> vector<1x128xf32>
    %383 = arith.addf %380, %382 : vector<1x128xf32>
    %c0_222 = arith.constant 0 : index
    %c0_223 = arith.constant 0 : index
    %384 = vector.load %arg15[%c0_222, %c0_223] : memref<1x128xf32, #tpu.memory_space<vmem>>, vector<1x128xf32>
    %385 = arith.addf %383, %384 : vector<1x128xf32>
    %386 = arith.negf %385 : vector<1x128xf32>
    %387 = math.exp %386 : vector<1x128xf32>
    %cst_224 = arith.constant 1.000000e+00 : f32
    %388 = vector.broadcast %cst_224 : f32 to vector<1x128xf32>
    %389 = arith.addf %388, %387 : vector<1x128xf32>
    %390 = arith.divf %388, %389 : vector<1x128xf32>
    %391 = math.tanh %385 : vector<1x128xf32>
    %392 = vector.extract_strided_slice %390 {offsets = [0, 0], sizes = [1, 32], strides = [1, 1]} : vector<1x128xf32> to vector<1x32xf32>
    %393 = vector.extract_strided_slice %390 {offsets = [0, 32], sizes = [1, 32], strides = [1, 1]} : vector<1x128xf32> to vector<1x32xf32>
    %394 = vector.extract_strided_slice %391 {offsets = [0, 64], sizes = [1, 32], strides = [1, 1]} : vector<1x128xf32> to vector<1x32xf32>
    %395 = vector.extract_strided_slice %390 {offsets = [0, 96], sizes = [1, 32], strides = [1, 1]} : vector<1x128xf32> to vector<1x32xf32>
    %396 = arith.mulf %393, %370 : vector<1x32xf32>
    %397 = arith.mulf %392, %394 : vector<1x32xf32>
    %398 = arith.addf %396, %397 : vector<1x32xf32>
    %399 = math.tanh %398 : vector<1x32xf32>
    %400 = arith.mulf %395, %399 : vector<1x32xf32>
    %c0_225 = arith.constant 0 : index
    %c0_226 = arith.constant 0 : index
    %401 = vector.load %arg16[%c0_225, %c0_226] : memref<32x128xf32, #tpu.memory_space<vmem>>, vector<32x128xf32>
    %cst_227 = arith.constant dense<0.000000e+00> : vector<1x128xf32>
    %402 = tpu.matmul %400, %401, %cst_227 {dimension_numbers = #tpu.dot_dimension_numbers<[1], [0], [0], [1], [0, 0, 1, 1], [], []>} : vector<1x32xf32>, vector<32x128xf32>, vector<1x128xf32> -> vector<1x128xf32>
    %c0_228 = arith.constant 0 : index
    %c0_229 = arith.constant 0 : index
    %403 = vector.load %arg17[%c0_228, %c0_229] : memref<1x128xf32, #tpu.memory_space<vmem>>, vector<1x128xf32>
    %404 = arith.addf %402, %403 : vector<1x128xf32>
    %c7_230 = arith.constant 7 : index
    %c0_231 = arith.constant 0 : index
    %405 = vector.load %arg20[%c7_230, %c0_231] : memref<8x128xf32, #tpu.memory_space<vmem>>, vector<1x128xf32>
    tpu.vector_store %arg20[%c7_230, %c0_231], %404 {strides = array<i32>} : memref<8x128xf32, #tpu.memory_space<vmem>>, vector<1x128xf32>,
    return
  }
  func.func @transform_0(%arg0: i32) -> (i32, i32) {
    %c0_i32 = arith.constant 0 : i32
    %c0_i32_0 = arith.constant 0 : i32
    %c0_i32_1 = arith.constant 0 : i32
    return %c0_i32, %c0_i32_0 : i32, i32
  }
  func.func @transform_1(%arg0: i32) -> (i32, i32) {
    %c0_i32 = arith.constant 0 : i32
    %c0_i32_0 = arith.constant 0 : i32
    %c0_i32_1 = arith.constant 0 : i32
    return %c0_i32, %c0_i32_0 : i32, i32
  }
  func.func @transform_2(%arg0: i32) -> (i32, i32) {
    %c0_i32 = arith.constant 0 : i32
    %c0_i32_0 = arith.constant 0 : i32
    %c0_i32_1 = arith.constant 0 : i32
    return %c0_i32, %c0_i32_0 : i32, i32
  }
  func.func @transform_3(%arg0: i32) -> (i32, i32) {
    %c0_i32 = arith.constant 0 : i32
    %c0_i32_0 = arith.constant 0 : i32
    %c0_i32_1 = arith.constant 0 : i32
    return %c0_i32, %c0_i32_0 : i32, i32
  }
  func.func @transform_4(%arg0: i32) -> (i32, i32) {
    %c0_i32 = arith.constant 0 : i32
    %c0_i32_0 = arith.constant 0 : i32
    %c0_i32_1 = arith.constant 0 : i32
    return %c0_i32, %c0_i32_0 : i32, i32
  }
  func.func @transform_5(%arg0: i32) -> (i32, i32) {
    %c0_i32 = arith.constant 0 : i32
    %c0_i32_0 = arith.constant 0 : i32
    %c0_i32_1 = arith.constant 0 : i32
    return %c0_i32, %c0_i32_0 : i32, i32
  }
  func.func @transform_6(%arg0: i32) -> (i32, i32) {
    %c0_i32 = arith.constant 0 : i32
    %c0_i32_0 = arith.constant 0 : i32
    %c0_i32_1 = arith.constant 0 : i32
    return %c0_i32, %c0_i32_0 : i32, i32
  }
  func.func @transform_7(%arg0: i32) -> (i32, i32) {
    %c0_i32 = arith.constant 0 : i32
    %c0_i32_0 = arith.constant 0 : i32
    %c0_i32_1 = arith.constant 0 : i32
    return %c0_i32, %c0_i32_0 : i32, i32
  }
  func.func @transform_8(%arg0: i32) -> (i32, i32) {
    %c0_i32 = arith.constant 0 : i32
    %c0_i32_0 = arith.constant 0 : i32
    %c0_i32_1 = arith.constant 0 : i32
    return %c0_i32, %c0_i32_0 : i32, i32
  }
  func.func @transform_9(%arg0: i32) -> (i32, i32) {
    %c0_i32 = arith.constant 0 : i32
    %c0_i32_0 = arith.constant 0 : i32
    %c0_i32_1 = arith.constant 0 : i32
    return %c0_i32, %c0_i32_0 : i32, i32
  }
  func.func @transform_10(%arg0: i32) -> (i32, i32) {
    %c0_i32 = arith.constant 0 : i32
    %c0_i32_0 = arith.constant 0 : i32
    %c0_i32_1 = arith.constant 0 : i32
    return %c0_i32, %c0_i32_0 : i32, i32
  }
  func.func @transform_11(%arg0: i32) -> (i32, i32) {
    %c0_i32 = arith.constant 0 : i32
    %c0_i32_0 = arith.constant 0 : i32
    %c0_i32_1 = arith.constant 0 : i32
    return %c0_i32, %c0_i32_0 : i32, i32
  }
  func.func @transform_12(%arg0: i32) -> (i32, i32) {
    %c0_i32 = arith.constant 0 : i32
    %c0_i32_0 = arith.constant 0 : i32
    %c0_i32_1 = arith.constant 0 : i32
    return %c0_i32, %c0_i32_0 : i32, i32
  }
  func.func @transform_13(%arg0: i32) -> (i32, i32) {
    %c0_i32 = arith.constant 0 : i32
    %c0_i32_0 = arith.constant 0 : i32
    %c0_i32_1 = arith.constant 0 : i32
    return %c0_i32, %c0_i32_0 : i32, i32
  }
  func.func @transform_14(%arg0: i32) -> (i32, i32) {
    %c0_i32 = arith.constant 0 : i32
    %c0_i32_0 = arith.constant 0 : i32
    %c0_i32_1 = arith.constant 0 : i32
    return %c0_i32, %c0_i32_0 : i32, i32
  }
  func.func @transform_15(%arg0: i32) -> (i32, i32) {
    %c0_i32 = arith.constant 0 : i32
    %c0_i32_0 = arith.constant 0 : i32
    %c0_i32_1 = arith.constant 0 : i32
    return %c0_i32, %c0_i32_0 : i32, i32
  }
  func.func @transform_16(%arg0: i32) -> (i32, i32) {
    %c0_i32 = arith.constant 0 : i32
    %c0_i32_0 = arith.constant 0 : i32
    %c0_i32_1 = arith.constant 0 : i32
    return %c0_i32, %c0_i32_0 : i32, i32
  }
  func.func @transform_17(%arg0: i32) -> (i32, i32) {
    %c0_i32 = arith.constant 0 : i32
    %c0_i32_0 = arith.constant 0 : i32
    %c0_i32_1 = arith.constant 0 : i32
    return %c0_i32, %c0_i32_0 : i32, i32
  }
  func.func @transform_18(%arg0: i32) -> (i32, i32) {
    %c0_i32 = arith.constant 0 : i32
    %c0_i32_0 = arith.constant 0 : i32
    %c0_i32_1 = arith.constant 0 : i32
    return %c0_i32, %c0_i32_0 : i32, i32
  }
  func.func @transform_19(%arg0: i32) -> (i32, i32) {
    %c0_i32 = arith.constant 0 : i32
    %c0_i32_0 = arith.constant 0 : i32
    %c0_i32_1 = arith.constant 0 : i32
    return %c0_i32, %c0_i32_0 : i32, i32
  }
  func.func @transform_20(%arg0: i32) -> (i32, i32) {
    %c0_i32 = arith.constant 0 : i32
    %c0_i32_0 = arith.constant 0 : i32
    %c0_i32_1 = arith.constant 0 : i32
    return %c0_i32, %c0_i32_0 : i32, i32
  }
}

</mosaic_0001>

<bundles_post_ra>
// kernel: tpu_custom_call.1
= control target key start
LH: loop header
LB: loop body
LE: loop exit
PB: predicated region body
PF: predicated region fallthrough
CT: control target
= control target key end

     0   :  { %s2959_s0 = inlined_call_operand.hbm [shape: f32[8,16], index: 0, kind: input, shape index: {}]   ;;  %s2960_s1 = inlined_call_operand.hbm [shape: f32[1,32], index: 1, kind: input, shape index: {}]   ;;  %s2961_s2 = inlined_call_operand.vmem [shape: f32[16,128], index: 2, kind: input, shape index: {}]   ;;  %s2962_s3 = inlined_call_operand.vmem [shape: f32[32,128], index: 3, kind: input, shape index: {}]   ;;  %s2963_s4 = inlined_call_operand.vmem [shape: f32[1,128], index: 4, kind: input, shape index: {}]   ;;  %s2964_s5 = inlined_call_operand.vmem [shape: f32[32,32], index: 5, kind: input, shape index: {}]   ;;  %s2965_s6 = inlined_call_operand.hbm [shape: f32[1,32], index: 6, kind: input, shape index: {}]   ;;  %s2966_s7 = inlined_call_operand.hbm [shape: f32[1,16], index: 7, kind: input, shape index: {}]   ;;  %s2967_s8 = inlined_call_operand.hbm [shape: f32[1,8], index: 8, kind: input, shape index: {}]   ;;  %s2968_s9 = inlined_call_operand.hbm [shape: f32[16,32], index: 9, kind: input, shape index: {}]   ;;  %s2969_s10 = inlined_call_operand.hbm [shape: f32[8,32], index: 10, kind: input, shape index: {}]   ;;  %s2970_s11 = inlined_call_operand.hbm [shape: f32[1,32], index: 11, kind: input, shape index: {}]   ;;  %s2971_s12 = inlined_call_operand.hbm [shape: f32[16,128], index: 12, kind: input, shape index: {}]   ;;  %s2972_s13 = inlined_call_operand.vmem [shape: f32[32,128], index: 13, kind: input, shape index: {}]   ;;  %s2973_s14 = inlined_call_operand.hbm [shape: f32[1,128], index: 14, kind: input, shape index: {}]   ;;  %s2974_s15 = inlined_call_operand.vmem [shape: f32[32,128], index: 15, kind: input, shape index: {}]   ;;  %s2975_s16 = inlined_call_operand.hbm [shape: f32[1,128], index: 16, kind: input, shape index: {}]   ;;  %s2976_s17 = inlined_call_operand.hbm [shape: f32[8,16], index: 17, kind: input, shape index: {}]   ;;  %s2977_s18 = inlined_call_operand.vmem [shape: f32[128,16], index: 18, kind: input, shape index: {}]   ;;  %s2978_s19 = inlined_call_operand.hbm [shape: f32[8,128], index: 19, kind: output, shape index: {0}]   ;;  %s2979_s20 = inlined_call_operand.hbm [shape: f32[1,32], index: 20, kind: output, shape index: {1}]  }
   0x1   :  { %2982 = sst [smem:[#allocation34_spill]] %s2959_s0 }
   0x2   :  { %2983 = sst [smem:[#allocation35_spill]] %s2960_s1 }
   0x3   :  { %2984 = sst [smem:[#allocation36_spill]] %s2961_s2 }
   0x4   :  { %2985 = sst [smem:[#allocation37_spill]] %s2962_s3 }
   0x5   :  { %2986 = sst [smem:[#allocation38_spill]] %s2963_s4 }
   0x6   :  { %26 = vsyncpa [#allocation3], 0 }
   0x7   :  { %27 = vsyncpa [#allocation6], 0 }
   0x8   :  { %28 = vsyncpa [#allocation9], 0 }
   0x9   :  { %29 = vsyncpa [#allocation12], 0 }
   0xa   :  { %30 = vsyncpa [#allocation15], 0 }
   0xb   :  { %31 = vsyncpa [#allocation18], 0 }
   0xc   :  { %32 = vsyncpa [#allocation21], 0 }
   0xd   :  { %33 = vsyncpa [#allocation4], 0  ;;  %s2987_s23 = sld [smem:[#allocation35_spill]] }
  0x13   :  { %s51_s24 = sshll.u32 %s2987_s23, 4  ;;  %s52_s24 = int_to_ptr.hbm [resolvable:$true] %s51_s24 }
  0x14   :  { %34 = vsyncpa [#allocation24], 0  ;;  %s2466_s18 = smov [#allocation5]   ;;  %s81_s26 = sshll.u32 %s2966_s7, 4  ;;  %s82_s26 = int_to_ptr.hbm [resolvable:$true] %s81_s26 }
  0x15   :  { %s53_s2 = sshll.u32 %s2466_s18, 4  ;;  %s2467_s27 = smov [#allocation8]   ;;  %s54_s2 = int_to_ptr.vmem [resolvable:$true] %s53_s2 }
  0x16   :  { %56 = dma.hbm_to_vmem [thread:$0]  %s52_s24, 16, %s54_s2, [#allocation6]  }
  0x17   :  { %s83_s28 = sshll.u32 %s2467_s27, 4  ;;  %s102_s30 = sshll.u32 %s2968_s9, 4  ;;  %s84_s28 = int_to_ptr.vmem [resolvable:$true] %s83_s28  ;;  %s103_s30 = int_to_ptr.hbm [resolvable:$true] %s102_s30 }
  0x18   :  { %86 = dma.hbm_to_vmem [thread:$0]  %s82_s26, 16, %s84_s28, [#allocation9]  }
  0x19   :  { %s2468_s0 = smov [#allocation11]   ;;  %s127_s23 = sshll.u32 %s2970_s11, 4  ;;  %s128_s23 = int_to_ptr.hbm [resolvable:$true] %s127_s23 }
  0x1a   :  { %s104_s21 = sshll.u32 %s2468_s0, 4  ;;  %s2469_s18 = smov 128   ;;  %s105_s21 = int_to_ptr.vmem [resolvable:$true] %s104_s21 }
  0x1b   :  { %s2470_s7 = smov 8   ;;  %s2471_s24 = smov [#allocation14]  }
  0x1c   :  { %110 = dma.hbm_to_vmem [thread:$0]  %s103_s30, 256, %s105_s21, [#allocation12], %s2469_s18, %s2469_s18, %s2470_s7  }
  0x1d   :  { %s129_s2 = sshll.u32 %s2471_s24, 4  ;;  %s153_s3 = sshll.u32 %s2973_s14, 4  ;;  %s130_s2 = int_to_ptr.vmem [resolvable:$true] %s129_s2  ;;  %s154_s3 = int_to_ptr.hbm [resolvable:$true] %s153_s3 }
  0x1e   :  { %132 = dma.hbm_to_vmem [thread:$0]  %s128_s23, 16, %s130_s2, [#allocation15]  }
  0x1f   :  { %s2988_s28 = sld [smem:[#allocation34_spill]]  ;;  %s2472_s4 = smov [#allocation17]  }
  0x20   :  { %s155_s29 = sshll.u32 %s2472_s4, 4  ;;  %s2473_s30 = smov [#allocation2]   ;;  %s156_s29 = int_to_ptr.vmem [resolvable:$true] %s155_s29 }
  0x21   :  { %158 = dma.hbm_to_vmem [thread:$0]  %s154_s3, 16, %s156_s29, [#allocation18]  }
  0x22   :  { %s42_s0 = sshll.u32 %s2473_s30, 4  ;;  %s70_s22 = sshll.u32 %s2965_s6, 4  ;;  %s43_s0 = int_to_ptr.vmem [resolvable:$true] %s42_s0  ;;  %s71_s22 = int_to_ptr.hbm [resolvable:$true] %s70_s22 }
  0x23   :  { %s92_s24 = sshll.u32 %s2967_s8, 4  ;;  %s2474_s2 = smov [#allocation7]   ;;  %s93_s24 = int_to_ptr.hbm [resolvable:$true] %s92_s24 }
  0x24   :  { %s72_s9 = sshll.u32 %s2474_s2, 4  ;;  %s2475_s25 = smov [#allocation10]   ;;  %s73_s9 = int_to_ptr.vmem [resolvable:$true] %s72_s9 }
  0x25   :  { %s40_s11 = sshll.u32 %s2988_s28, 4  ;;  %s94_s3 = sshll.u32 %s2475_s25, 4  ;;  %s41_s11 = int_to_ptr.hbm [resolvable:$true] %s40_s11  ;;  %s95_s3 = int_to_ptr.vmem [resolvable:$true] %s94_s3 }
  0x26   :  { %45 = dma.hbm_to_vmem [thread:$0]  %s41_s11, 128, %s43_s0, [#allocation3]  }
  0x27   :  { %75 = dma.hbm_to_vmem [thread:$0]  %s71_s22, 16, %s73_s9, [#allocation6]  }
  0x28   :  { %s116_s28 = sshll.u32 %s2969_s10, 4  ;;  %s137_s4 = sshll.u32 %s2971_s12, 4  ;;  %s117_s28 = int_to_ptr.hbm [resolvable:$true] %s116_s28  ;;  %s138_s4 = int_to_ptr.hbm [resolvable:$true] %s137_s4 }
  0x29   :  { %97 = dma.hbm_to_vmem [thread:$0]  %s93_s24, 16, %s95_s3, [#allocation9]  }
  0x2a   :  { %s2476_s29 = smov [#allocation13]   ;;  %s2477_s30 = smov [#allocation16]  }
  0x2b   :  { %s118_s8 = sshll.u32 %s2476_s29, 4  ;;  %s139_s0 = sshll.u32 %s2477_s30, 4  ;;  %s119_s8 = int_to_ptr.vmem [resolvable:$true] %s118_s8  ;;  %s140_s0 = int_to_ptr.vmem [resolvable:$true] %s139_s0 }
  0x2c   :  { %121 = dma.hbm_to_vmem [thread:$0]  %s117_s28, 128, %s119_s8, [#allocation12]  }
  0x2d   :  { %s166_s22 = sshll.u32 %s2975_s16, 4  ;;  %s177_s12 = sshll.u32 %s2976_s17, 4  ;;  %s167_s22 = int_to_ptr.hbm [resolvable:$true] %s166_s22  ;;  %s178_s12 = int_to_ptr.hbm [resolvable:$true] %s177_s12 }
  0x2e   :  { %145 = dma.hbm_to_vmem [thread:$0]  %s138_s4, 256, %s140_s0, [#allocation15], %s2469_s18, %s2469_s18, %s2470_s7  }
  0x2f   :  { %s2478_s23 = smov [#allocation19]   ;;  %s2479_s2 = smov [#allocation20]  }
  0x30   :  { %s168_s24 = sshll.u32 %s2478_s23, 4  ;;  %s179_s9 = sshll.u32 %s2479_s2, 4  ;;  %s169_s24 = int_to_ptr.vmem [resolvable:$true] %s168_s24  ;;  %s180_s9 = int_to_ptr.vmem [resolvable:$true] %s179_s9 }
  0x31   :  { %171 = dma.hbm_to_vmem [thread:$0]  %s167_s22, 16, %s169_s24, [#allocation18]  }
  0x32   :  { %182 = dma.hbm_to_vmem [thread:$0]  %s178_s12, 128, %s180_s9, [#allocation21]  }
  0x33   :  { %2448 = dma.done.wait [#allocation3], 128  }
  0x34   :  { %2449 = vsyncadd [#allocation3], 4294967168 }
  0x35   :  { %2450 = dma.done.wait [#allocation6], 32  }
  0x36   :  { %2451 = vsyncadd [#allocation6], 4294967264 }
  0x37   :  { %2452 = dma.done.wait [#allocation9], 32  }
  0x38   :  { %2453 = vsyncadd [#allocation9], 4294967264 }
  0x39   :  { %2454 = dma.done.wait [#allocation12], 384  }
  0x3a   :  { %2455 = vsyncadd [#allocation12], 4294966912 }
  0x3b   :  { %2456 = dma.done.wait [#allocation15], 272  }
  0x3c   :  { %2457 = vsyncadd [#allocation15], 4294967024 }
  0x3d   :  { %2458 = dma.done.wait [#allocation18], 32  }
  0x3e   :  { %2459 = vsyncadd [#allocation18], 4294967264 }
  0x3f   :  { %2460 = dma.done.wait [#allocation21], 128  }
  0x40   :  { %2461 = vsyncadd [#allocation21], 4294967168  ;;  %s2989_s18 = sld [smem:[#allocation37_spill]]  ;;  %v234_v5 = vld [vmem:[#allocation2] sm:$0x1]  ;;  %vm265_vm0 = vcmask 130048  }
  0x41   :  { %s2990_s27 = sld [smem:[#allocation36_spill]]  ;;  %v233_v7 = vld [vmem:[#allocation5] sm:$0x1]  ;;  %vm241_vm1 = vcmask 261120   ;;  %s2480_s1 = smov 64  }
  0x42   :  { %s2991_s21 = sld [smem:[#allocation38_spill]]  ;;  %s2481_s22 = smov 32   ;;  %v328_v35 = vld [vmem:[#allocation2 + $0x1] sm:$0x1]  ;;  %v415_v61 = vld [vmem:[#allocation2 + $0x2] sm:$0x1] }
  0x43   :  { %s1894_s12 = sshll.u32 %s2979_s20, 4  ;;  %s2485_s23 = smov [#allocation22]   ;;  %s1895_s12 = int_to_ptr.hbm [resolvable:$true] %s1894_s12 }
  0x44   :  { %s1881_s24 = sshll.u32 %s2485_s23, 4  ;;  %s1883_s9 = sshll.u32 %s2978_s19, 4  ;;  %s1882_s24 = int_to_ptr.vmem [resolvable:$true] %s1881_s24  ;;  %s1884_s9 = int_to_ptr.hbm [resolvable:$true] %s1883_s9 }
  0x46   :  { %v2636_v0 = vld [vmem:[%s2989_s18 + $0x18] sm:$0xff]  ;;  %v2641_v1 = vld [vmem:[%s2989_s18 + $0x10] sm:$0xff]  ;;  %v2658_v4 = vld [vmem:[%s2989_s18 + $0x8] sm:$0xff] }
  0x47   :  { %257 = vmatpush.msra.mxu0 %v2636_v0  ;;  %v2647_v2 = vld [vmem:[%s2990_s27 + $0x8] sm:$0xff]  ;;  %v2652_v3 = vld [vmem:[%s2990_s27] sm:$0xff]  ;;  %346 = vmatpush.msra.mxu2 %v2636_v0 }
  0x48   :  { %283 = vmatpush.msra.mxu1 %v2647_v2  ;;  %371 = vmatpush.msra.mxu3 %v2647_v2  ;;  %v2667_v6 = vld [vmem:[%s2989_s18] sm:$0xff] }
  0x49   :  { %258 = vmatpush.msra.mxu0 %v2641_v1  ;;  %347 = vmatpush.msra.mxu2 %v2641_v1  ;;  %v2700_v10 = vld [vmem:[%s2991_s21] sm:$0x1] }
  0x4a   :  { %284 = vmatpush.msra.mxu1 %v2652_v3  ;;  %372 = vmatpush.msra.mxu3 %v2652_v3 }
  0x4b   :  { %259 = vmatpush.msra.mxu0 %v2658_v4  ;;  %1916 = vmatmul.msk.f32.vlgmr.msra.gmra.mxu1 %vm265_vm0, %v234_v5 }
  0x4c   :  { %348 = vmatpush.msra.mxu2 %v2658_v4  ;;  %458 = vmatpush.msrb.mxu3 %v2647_v2 }
  0x4d   :  { %260 = vmatpush.msra.mxu0 %v2667_v6  ;;  %433 = vmatpush.msrb.mxu1 %v2636_v0 }
  0x4e   :  { %1915 = vmatmul.msk.f32.vlgmr.msra.gmra.mxu0 %vm241_vm1, %v233_v7  ;;  %349 = vmatpush.msra.mxu2 %v2667_v6 }
  0x4f   :  { %459 = vmatpush.msrb.mxu3 %v2652_v3  ;;  %434 = vmatpush.msrb.mxu1 %v2641_v1 }
  0x50   :  { %545 = vmatpush.msrb.mxu2 %v2647_v2  ;;  %520 = vmatpush.msrb.mxu0 %v2636_v0 }
  0x51   :  { %435 = vmatpush.msrb.mxu1 %v2658_v4  ;;  %1919 = vmatmul.msk.f32.vlgmr.msra.gmra.mxu3 %vm265_vm0, %v328_v35 }
  0x52   :  { %546 = vmatpush.msrb.mxu2 %v2652_v3  ;;  %521 = vmatpush.msrb.mxu0 %v2641_v1 }
  0x53   :  { %436 = vmatpush.msrb.mxu1 %v2667_v6  ;;  %632 = vmatpush.msra.mxu3 %v2647_v2 }
  0x54   :  { %522 = vmatpush.msrb.mxu0 %v2658_v4 }
  0x55   :  { %607 = vmatpush.msra.mxu1 %v2636_v0  ;;  %633 = vmatpush.msra.mxu3 %v2652_v3 }
  0x56   :  { %523 = vmatpush.msrb.mxu0 %v2667_v6 }
  0x57   :  { %608 = vmatpush.msra.mxu1 %v2641_v1 }
  0x58   :  { %694 = vmatpush.msra.mxu0 %v2636_v0 }
  0x59   :  { %609 = vmatpush.msra.mxu1 %v2658_v4  ;;  %1922 = vmatmul.msk.f32.vlgmr.msrb.gmra.mxu3 %vm265_vm0, %v415_v61 }
  0x5a   :  { %695 = vmatpush.msra.mxu0 %v2641_v1  ;;  %806 = vmatpush.msrb.mxu3 %v2647_v2 }
  0x5b   :  { %610 = vmatpush.msra.mxu1 %v2667_v6 }
  0x5c   :  { %696 = vmatpush.msra.mxu0 %v2658_v4  ;;  %807 = vmatpush.msrb.mxu3 %v2652_v3 }
  0x5e   :  { %697 = vmatpush.msra.mxu0 %v2667_v6 }
  0xc8   :  { %v286_v8 = vpop.f32.mrf.mxu1 }
  0xcb   :  { %v262_v9 = vpop.f32.mrf.mxu0 }
  0xcc   :  { %v287_v11 = vadd.f32 %v286_v8, %v262_v9 }
  0xce   :  { %v290_v12 = vadd.f32 %v2700_v10, %v287_v11 }
  0xd0   :  { %1990 = vtanh.f32 %v290_v12  ;;  %v1917_v14 = vmul.f32 -1.442695, %v290_v12 }
  0xd2   :  { %1992 = vpow2.f32 %v1917_v14 }
  0xd4   :  { %v374_v37 = vpop.f32.mrf.mxu3 }
  0xd6   :  { %v1991_v13 = vpop.eup %1990 }
  0xd7   :  { %313 = vrot.lane.b32.xlu0 %v1991_v13, %s2480_s1 }
  0xd8   :  { %v1993_v15 = vpop.eup %1992 }
  0xd9   :  { %v294_v16 = vadd.f32 1.0, %v1993_v15 }
  0xdb   :  { %1994 = vrcp.f32 %v294_v16  ;;  %v306_v22 = vand.u32 2147483648, %v294_v16  ;;  %vm300_vm3 = vweird.f32 %v294_v16  ;;  %v304_v23 = vand.u32 2147483647, %v294_v16 }
  0xdc   :  { %v461_v7 = vpop.f32.mrf.mxu3 }
  0xdd   :  { %v307_v25 = vor.u32 1.1754944e-38, %v306_v22  ;;  %vm305_vm5 = vcmp.eq.f32.partialorder %v304_v23, 8.507059e+37 }
  0xe1   :  { %v1995_v17 = vpop.eup %1994 }
  0xe2   :  { %v296_v18 = vmul.f32 %v1995_v17, %v294_v16  ;;  %vm301_vm2 = vweird.f32 %v1995_v17 }
  0xe3   :  { %vm302_vm4 = vmor %vm300_vm3, %vm301_vm2 }
  0xe4   :  { %v297_v19 = vsub.f32 1.0, %v296_v18 }
  0xe6   :  { %v298_v20 = vmul.f32 %v1995_v17, %v297_v19 }
  0xe8   :  { %v299_v21 = vadd.f32 %v1995_v17, %v298_v20 }
  0xea   :  { %v303_v24 = vsel %vm302_vm4, %v1995_v17, %v299_v21 }
  0xeb   :  { %v308_v27 = vsel %vm305_vm5, %v307_v25, %v303_v24 }
  0xec   :  { %v311_v29 = vmul.f32 0.0, %v308_v27 }
 0x149   :  { %v314_v26 = vpop.permute.xlu0 %313 }
 0x14a   :  { %v316_v28 = vmul.f32 %v314_v26, %v308_v27 }
 0x14c   :  { %318 = vrot.lane.b32.xlu0 %v316_v28, %s2481_s22 }
 0x1be   :  { %v319_v30 = vpop.permute.xlu0 %318 }
 0x1bf   :  { %v321_v31 = vadd.f32 %v319_v30, %v311_v29 }
 0x1c1   :  { %1996 = vtanh.f32 %v321_v31 }
 0x1c7   :  { %v1997_v32 = vpop.eup %1996 }
 0x1c8   :  { %324 = vrot.lane.b32.xlu1 %v1997_v32, %s2480_s1  ;;  %v502_v32 = vld [vmem:[#allocation2 + $0x3] sm:$0x1] }
 0x23a   :  { %v325_v33 = vpop.permute.xlu1 %324 }
 0x23b   :  { %v327_v34 = vmul.f32 %v325_v33, %v308_v27 }
 0x23d   :  { %330 = vrot.lane.b32.xlu1 %v327_v34, %s2481_s22 }
 0x2af   :  { %v331_v36 = vpop.permute.xlu1 %330 }
 0x2b0   :  { %1918 = vmatmul.msk.f32.vlgmr.msra.gmra.mxu2 %vm241_vm1, %v331_v36 }
 0x2b1   :  { %719 = vmatpush.msra.mxu2 %v2647_v2 }
 0x2b3   :  { %720 = vmatpush.msra.mxu2 %v2652_v3 }
 0x2b8   :  { %1925 = vmatmul.msk.f32.vlgmr.msrb.gmra.mxu2 %vm265_vm0, %v502_v32 }
 0x2b9   :  { %893 = vmatpush.msrb.mxu2 %v2647_v2 }
 0x2bb   :  { %894 = vmatpush.msrb.mxu2 %v2652_v3 }
 0x333   :  { %v351_v38 = vpop.f32.mrf.mxu2 }
 0x334   :  { %v375_v39 = vadd.f32 %v374_v37, %v351_v38 }
 0x336   :  { %v377_v40 = vadd.f32 %v375_v39, %v2700_v10 }
 0x338   :  { %1998 = vtanh.f32 %v377_v40  ;;  %v1920_v42 = vmul.f32 -1.442695, %v377_v40 }
 0x33a   :  { %2000 = vpow2.f32 %v1920_v42 }
 0x33b   :  { %v548_v36 = vpop.f32.mrf.mxu2 }
 0x33e   :  { %v1999_v41 = vpop.eup %1998 }
 0x33f   :  { %400 = vrot.lane.b32.xlu2 %v1999_v41, %s2480_s1 }
 0x340   :  { %v2001_v43 = vpop.eup %2000 }
 0x341   :  { %v381_v44 = vadd.f32 1.0, %v2001_v43 }
 0x343   :  { %2002 = vrcp.f32 %v381_v44  ;;  %v393_v50 = vand.u32 2147483648, %v381_v44  ;;  %vm387_vm7 = vweird.f32 %v381_v44  ;;  %v391_v51 = vand.u32 2147483647, %v381_v44 }
 0x345   :  { %v394_v53 = vor.u32 1.1754944e-38, %v393_v50  ;;  %vm392_vm9 = vcmp.eq.f32.partialorder %v391_v51, 8.507059e+37 }
 0x349   :  { %v2003_v45 = vpop.eup %2002 }
 0x34a   :  { %v383_v46 = vmul.f32 %v2003_v45, %v381_v44  ;;  %vm388_vm6 = vweird.f32 %v2003_v45 }
 0x34b   :  { %vm389_vm8 = vmor %vm387_vm7, %vm388_vm6 }
 0x34c   :  { %v384_v47 = vsub.f32 1.0, %v383_v46 }
 0x34e   :  { %v385_v48 = vmul.f32 %v2003_v45, %v384_v47 }
 0x350   :  { %v386_v49 = vadd.f32 %v2003_v45, %v385_v48 }
 0x352   :  { %v390_v52 = vsel %vm389_vm8, %v2003_v45, %v386_v49 }
 0x353   :  { %v395_v55 = vsel %vm392_vm9, %v394_v53, %v390_v52 }
 0x354   :  { %v398_v57 = vmul.f32 %v395_v55, %v321_v31 }
 0x399   :  { %v401_v54 = vpop.permute.xlu2 %400 }
 0x39a   :  { %v403_v56 = vmul.f32 %v401_v54, %v395_v55  ;;  %v589_v54 = vld [vmem:[#allocation2 + $0x4] sm:$0x1] }
 0x39b   :  { %1928 = vmatmul.msk.f32.vlgmr.msra.gmra.mxu3 %vm265_vm0, %v589_v54 }
 0x39c   :  { %405 = vrot.lane.b32.xlu2 %v403_v56, %s2481_s22 }
 0x3f6   :  { %v406_v58 = vpop.permute.xlu2 %405 }
 0x3f7   :  { %v408_v59 = vadd.f32 %v406_v58, %v398_v57 }
 0x3f9   :  { %2004 = vtanh.f32 %v408_v59 }
 0x3ff   :  { %v2005_v60 = vpop.eup %2004 }
 0x400   :  { %411 = vrot.lane.b32.xlu0 %v2005_v60, %s2480_s1 }
 0x41e   :  { %v635_v58 = vpop.f32.mrf.mxu3 }
 0x472   :  { %v412_v62 = vpop.permute.xlu0 %411 }
 0x473   :  { %v414_v63 = vmul.f32 %v412_v62, %v395_v55 }
 0x475   :  { %417 = vrot.lane.b32.xlu1 %v414_v63, %s2481_s22 }
 0x4e7   :  { %v418_v5 = vpop.permute.xlu1 %417 }
 0x4e8   :  { %1921 = vmatmul.msk.f32.vlgmr.msrb.gmra.mxu1 %vm241_vm1, %v418_v5 }
 0x4e9   :  { %781 = vmatpush.msrb.mxu1 %v2636_v0 }
 0x4eb   :  { %782 = vmatpush.msrb.mxu1 %v2641_v1 }
 0x4ed   :  { %783 = vmatpush.msrb.mxu1 %v2658_v4 }
 0x4ef   :  { %784 = vmatpush.msrb.mxu1 %v2667_v6 }
 0x565   :  { %v438_v8 = vpop.f32.mrf.mxu1 }
 0x566   :  { %v462_v9 = vadd.f32 %v461_v7, %v438_v8 }
 0x568   :  { %v464_v11 = vadd.f32 %v462_v9, %v2700_v10 }
 0x56a   :  { %2006 = vtanh.f32 %v464_v11  ;;  %v1923_v13 = vmul.f32 -1.442695, %v464_v11 }
 0x56c   :  { %2008 = vpow2.f32 %v1923_v13 }
 0x570   :  { %v2007_v12 = vpop.eup %2006 }
 0x571   :  { %487 = vrot.lane.b32.xlu2 %v2007_v12, %s2480_s1 }
 0x572   :  { %v2009_v14 = vpop.eup %2008 }
 0x573   :  { %v468_v15 = vadd.f32 1.0, %v2009_v14 }
 0x575   :  { %2010 = vrcp.f32 %v468_v15  ;;  %v480_v21 = vand.u32 2147483648, %v468_v15  ;;  %vm474_vm11 = vweird.f32 %v468_v15  ;;  %v478_v22 = vand.u32 2147483647, %v468_v15 }
 0x577   :  { %v481_v24 = vor.u32 1.1754944e-38, %v480_v21  ;;  %vm479_vm13 = vcmp.eq.f32.partialorder %v478_v22, 8.507059e+37 }
 0x57b   :  { %v2011_v16 = vpop.eup %2010 }
 0x57c   :  { %v470_v17 = vmul.f32 %v2011_v16, %v468_v15  ;;  %vm475_vm10 = vweird.f32 %v2011_v16 }
 0x57d   :  { %vm476_vm12 = vmor %vm474_vm11, %vm475_vm10 }
 0x57e   :  { %v471_v18 = vsub.f32 1.0, %v470_v17 }
 0x580   :  { %v472_v19 = vmul.f32 %v2011_v16, %v471_v18 }
 0x582   :  { %v473_v20 = vadd.f32 %v2011_v16, %v472_v19 }
 0x584   :  { %v477_v23 = vsel %vm476_vm12, %v2011_v16, %v473_v20 }
 0x585   :  { %v482_v26 = vsel %vm479_vm13, %v481_v24, %v477_v23 }
 0x586   :  { %v485_v28 = vmul.f32 %v482_v26, %v408_v59 }
 0x5cb   :  { %v488_v25 = vpop.permute.xlu2 %487 }
 0x5cc   :  { %v490_v27 = vmul.f32 %v488_v25, %v482_v26  ;;  %v676_v25 = vld [vmem:[#allocation2 + $0x5] sm:$0x1] }
 0x5cd   :  { %1931 = vmatmul.msk.f32.vlgmr.msra.gmra.mxu2 %vm265_vm0, %v676_v25 }
 0x5ce   :  { %492 = vrot.lane.b32.xlu0 %v490_v27, %s2481_s22 }
 0x640   :  { %v493_v29 = vpop.permute.xlu0 %492 }
 0x641   :  { %v495_v30 = vadd.f32 %v493_v29, %v485_v28 }
 0x643   :  { %2012 = vtanh.f32 %v495_v30 }
 0x649   :  { %v2013_v31 = vpop.eup %2012 }
 0x64a   :  { %498 = vrot.lane.b32.xlu1 %v2013_v31, %s2480_s1 }
 0x650   :  { %v722_v29 = vpop.f32.mrf.mxu2 }
 0x6bc   :  { %v499_v33 = vpop.permute.xlu1 %498 }
 0x6bd   :  { %v501_v34 = vmul.f32 %v499_v33, %v482_v26 }
 0x6bf   :  { %504 = vrot.lane.b32.xlu2 %v501_v34, %s2481_s22 }
 0x719   :  { %v505_v35 = vpop.permute.xlu2 %504 }
 0x71a   :  { %1924 = vmatmul.msk.f32.vlgmr.msrb.gmra.mxu0 %vm241_vm1, %v505_v35 }
 0x71b   :  { %868 = vmatpush.msrb.mxu0 %v2636_v0 }
 0x71d   :  { %869 = vmatpush.msrb.mxu0 %v2641_v1 }
 0x71f   :  { %870 = vmatpush.msrb.mxu0 %v2658_v4 }
 0x721   :  { %871 = vmatpush.msrb.mxu0 %v2667_v6 }
 0x797   :  { %v525_v37 = vpop.f32.mrf.mxu0 }
 0x798   :  { %v549_v2 = vadd.f32 %v548_v36, %v525_v37 }
 0x79a   :  { %v551_v3 = vadd.f32 %v549_v2, %v2700_v10 }
 0x79c   :  { %2014 = vtanh.f32 %v551_v3  ;;  %v1926_v39 = vmul.f32 -1.442695, %v551_v3 }
 0x79e   :  { %2016 = vpow2.f32 %v1926_v39 }
 0x7a2   :  { %v2015_v38 = vpop.eup %2014 }
 0x7a3   :  { %574 = vrot.lane.b32.xlu0 %v2015_v38, %s2480_s1 }
 0x7a4   :  { %v2017_v40 = vpop.eup %2016 }
 0x7a5   :  { %v555_v41 = vadd.f32 1.0, %v2017_v40 }
 0x7a7   :  { %2018 = vrcp.f32 %v555_v41  ;;  %v567_v6 = vand.u32 2147483648, %v555_v41  ;;  %vm561_vm15 = vweird.f32 %v555_v41  ;;  %v565_v44 = vand.u32 2147483647, %v555_v41 }
 0x7a9   :  { %v568_v46 = vor.u32 1.1754944e-38, %v567_v6  ;;  %vm566_vm3 = vcmp.eq.f32.partialorder %v565_v44, 8.507059e+37 }
 0x7ad   :  { %v2019_v0 = vpop.eup %2018 }
 0x7ae   :  { %v557_v1 = vmul.f32 %v2019_v0, %v555_v41  ;;  %vm562_vm14 = vweird.f32 %v2019_v0 }
 0x7af   :  { %vm563_vm2 = vmor %vm561_vm15, %vm562_vm14 }
 0x7b0   :  { %v558_v42 = vsub.f32 1.0, %v557_v1 }
 0x7b2   :  { %v559_v4 = vmul.f32 %v2019_v0, %v558_v42 }
 0x7b4   :  { %v560_v43 = vadd.f32 %v2019_v0, %v559_v4 }
 0x7b6   :  { %v564_v45 = vsel %vm563_vm2, %v2019_v0, %v560_v43 }
 0x7b7   :  { %v569_v48 = vsel %vm566_vm3, %v568_v46, %v564_v45 }
 0x7b8   :  { %v572_v50 = vmul.f32 %v569_v48, %v495_v30 }
 0x815   :  { %v575_v47 = vpop.permute.xlu0 %574 }
 0x816   :  { %v577_v49 = vmul.f32 %v575_v47, %v569_v48  ;;  %v763_v47 = vld [vmem:[#allocation2 + $0x6] sm:$0x1] }
 0x817   :  { %1934 = vmatmul.msk.f32.vlgmr.msrb.gmra.mxu3 %vm265_vm0, %v763_v47  ;;  %v980_v47 = vld [vmem:[#allocation11 + $0x8] sm:$0xff] }
 0x818   :  { %579 = vrot.lane.b32.xlu1 %v577_v49, %s2481_s22 }
 0x88a   :  { %v580_v51 = vpop.permute.xlu1 %579 }
 0x88b   :  { %v582_v52 = vadd.f32 %v580_v51, %v572_v50 }
 0x88d   :  { %2020 = vtanh.f32 %v582_v52 }
 0x893   :  { %v2021_v53 = vpop.eup %2020 }
 0x894   :  { %585 = vrot.lane.b32.xlu2 %v2021_v53, %s2480_s1 }
 0x89a   :  { %v809_v51 = vpop.f32.mrf.mxu3 }
 0x8ee   :  { %v586_v55 = vpop.permute.xlu2 %585 }
 0x8ef   :  { %v588_v56 = vmul.f32 %v586_v55, %v569_v48 }
 0x8f1   :  { %591 = vrot.lane.b32.xlu0 %v588_v56, %s2481_s22 }
 0x963   :  { %v592_v57 = vpop.permute.xlu0 %591 }
 0x964   :  { %1927 = vmatmul.msk.f32.vlgmr.msra.gmra.mxu1 %vm241_vm1, %v592_v57 }
 0x9e1   :  { %v612_v59 = vpop.f32.mrf.mxu1 }
 0x9e2   :  { %v636_v60 = vadd.f32 %v635_v58, %v612_v59 }
 0x9e4   :  { %v638_v61 = vadd.f32 %v636_v60, %v2700_v10 }
 0x9e6   :  { %2022 = vtanh.f32 %v638_v61  ;;  %v1929_v63 = vmul.f32 -1.442695, %v638_v61 }
 0x9e8   :  { %2024 = vpow2.f32 %v1929_v63 }
 0x9ec   :  { %v2023_v62 = vpop.eup %2022 }
 0x9ed   :  { %661 = vrot.lane.b32.xlu1 %v2023_v62, %s2480_s1 }
 0x9ee   :  { %v2025_v5 = vpop.eup %2024 }
 0x9ef   :  { %v642_v7 = vadd.f32 1.0, %v2025_v5 }
 0x9f1   :  { %2026 = vrcp.f32 %v642_v7  ;;  %v654_v14 = vand.u32 2147483648, %v642_v7  ;;  %vm648_vm5 = vweird.f32 %v642_v7  ;;  %v652_v15 = vand.u32 2147483647, %v642_v7 }
 0x9f3   :  { %v655_v17 = vor.u32 1.1754944e-38, %v654_v14  ;;  %vm653_vm7 = vcmp.eq.f32.partialorder %v652_v15, 8.507059e+37 }
 0x9f7   :  { %v2027_v8 = vpop.eup %2026 }
 0x9f8   :  { %v644_v9 = vmul.f32 %v2027_v8, %v642_v7  ;;  %vm649_vm4 = vweird.f32 %v2027_v8 }
 0x9f9   :  { %vm650_vm6 = vmor %vm648_vm5, %vm649_vm4 }
 0x9fa   :  { %v645_v11 = vsub.f32 1.0, %v644_v9 }
 0x9fc   :  { %v646_v12 = vmul.f32 %v2027_v8, %v645_v11 }
 0x9fe   :  { %v647_v13 = vadd.f32 %v2027_v8, %v646_v12 }
 0xa00   :  { %v651_v16 = vsel %vm650_vm6, %v2027_v8, %v647_v13  ;;  %vm983_vm6 = vcmask 64512  }
 0xa01   :  { %v656_v19 = vsel %vm653_vm7, %v655_v17, %v651_v16  ;;  %vm967_vm7 = vcmask 253952  }
 0xa02   :  { %v659_v21 = vmul.f32 %v656_v19, %v582_v52 }
 0xa5f   :  { %v662_v18 = vpop.permute.xlu1 %661 }
 0xa60   :  { %v664_v20 = vmul.f32 %v662_v18, %v656_v19  ;;  %v850_v18 = vld [vmem:[#allocation2 + $0x7] sm:$0x1] }
 0xa61   :  { %1937 = vmatmul.msk.f32.vlgmr.msrb.gmra.mxu2 %vm265_vm0, %v850_v18 }
 0xa62   :  { %666 = vrot.lane.b32.xlu2 %v664_v20, %s2481_s22 }
 0xabc   :  { %v667_v22 = vpop.permute.xlu2 %666 }
 0xabd   :  { %v669_v23 = vadd.f32 %v667_v22, %v659_v21 }
 0xabf   :  { %2028 = vtanh.f32 %v669_v23 }
 0xac5   :  { %v2029_v24 = vpop.eup %2028 }
 0xac6   :  { %672 = vrot.lane.b32.xlu0 %v2029_v24, %s2480_s1 }
 0xae4   :  { %v896_v22 = vpop.f32.mrf.mxu2 }
 0xb38   :  { %v673_v26 = vpop.permute.xlu0 %672 }
 0xb39   :  { %v675_v27 = vmul.f32 %v673_v26, %v656_v19 }
 0xb3b   :  { %678 = vrot.lane.b32.xlu1 %v675_v27, %s2481_s22 }
 0xbad   :  { %v679_v28 = vpop.permute.xlu1 %678 }
 0xbae   :  { %1930 = vmatmul.msk.f32.vlgmr.msra.gmra.mxu0 %vm241_vm1, %v679_v28 }
 0xbaf   :  { %1024 = vmatpush.msra.mxu0 %v980_v47  ;;  %v1129_v47 = vld [vmem:[#allocation19] sm:$0x1] }
 0xc2b   :  { %v699_v30 = vpop.f32.mrf.mxu0 }
 0xc2c   :  { %v723_v31 = vadd.f32 %v722_v29, %v699_v30 }
 0xc2e   :  { %v725_v32 = vadd.f32 %v723_v31, %v2700_v10 }
 0xc30   :  { %2030 = vtanh.f32 %v725_v32  ;;  %v1932_v34 = vmul.f32 -1.442695, %v725_v32 }
 0xc32   :  { %2032 = vpow2.f32 %v1932_v34 }
 0xc36   :  { %v2031_v33 = vpop.eup %2030 }
 0xc37   :  { %748 = vrot.lane.b32.xlu2 %v2031_v33, %s2480_s1 }
 0xc38   :  { %v2033_v35 = vpop.eup %2032 }
 0xc39   :  { %v729_v36 = vadd.f32 1.0, %v2033_v35 }
 0xc3b   :  { %2034 = vrcp.f32 %v729_v36  ;;  %v741_v40 = vand.u32 2147483648, %v729_v36  ;;  %vm735_vm9 = vweird.f32 %v729_v36  ;;  %v739_v41 = vand.u32 2147483647, %v729_v36 }
 0xc3d   :  { %v742_v1 = vor.u32 1.1754944e-38, %v741_v40  ;;  %vm740_vm11 = vcmp.eq.f32.partialorder %v739_v41, 8.507059e+37 }
 0xc41   :  { %v2035_v37 = vpop.eup %2034 }
 0xc42   :  { %v731_v2 = vmul.f32 %v2035_v37, %v729_v36  ;;  %vm736_vm8 = vweird.f32 %v2035_v37 }
 0xc43   :  { %vm737_vm10 = vmor %vm735_vm9, %vm736_vm8 }
 0xc44   :  { %v732_v3 = vsub.f32 1.0, %v731_v2 }
 0xc46   :  { %v733_v38 = vmul.f32 %v2035_v37, %v732_v3 }
 0xc48   :  { %v734_v39 = vadd.f32 %v2035_v37, %v733_v38 }
 0xc4a   :  { %v738_v0 = vsel %vm737_vm10, %v2035_v37, %v734_v39 }
 0xc4b   :  { %v743_v4 = vsel %vm740_vm11, %v742_v1, %v738_v0  ;;  %v940_v1 = vld [vmem:[%s2964_s5 + $0x18] sm:$0xff] }
 0xc4c   :  { %v746_v6 = vmul.f32 %v743_v4, %v669_v23  ;;  %959 = vmatpush.msra.mxu1 %v940_v1 }
 0xc91   :  { %v749_v42 = vpop.permute.xlu2 %748 }
 0xc92   :  { %v751_v43 = vmul.f32 %v749_v42, %v743_v4  ;;  %v939_v42 = vld [vmem:[%s2964_s5 + $0x10] sm:$0xff] }
 0xc93   :  { %960 = vmatpush.msra.mxu1 %v939_v42 }
 0xc94   :  { %753 = vrot.lane.b32.xlu0 %v751_v43, %s2481_s22  ;;  %v937_v43 = vld [vmem:[%s2964_s5] sm:$0xff] }
 0xd06   :  { %v754_v44 = vpop.permute.xlu0 %753 }
 0xd07   :  { %v756_v45 = vadd.f32 %v754_v44, %v746_v6 }
 0xd09   :  { %2036 = vtanh.f32 %v756_v45 }
 0xd0f   :  { %v2037_v46 = vpop.eup %2036 }
 0xd10   :  { %759 = vrot.lane.b32.xlu1 %v2037_v46, %s2480_s1  ;;  %v982_v46 = vld [vmem:[#allocation13] sm:$0xff] }
 0xd11   :  { %1002 = vmatpush.msra.mxu3 %v982_v46 }
 0xd82   :  { %v760_v48 = vpop.permute.xlu1 %759 }
 0xd83   :  { %v762_v49 = vmul.f32 %v760_v48, %v743_v4  ;;  %v938_v4 = vld [vmem:[%s2964_s5 + $0x8] sm:$0xff]  ;;  %s2482_s5 = smov 112  }
 0xd84   :  { %961 = vmatpush.msra.mxu1 %v938_v4  ;;  %v981_v48 = vld [vmem:[#allocation10] sm:$0x1]  ;;  %v2483_v4 = vmov 0.0  }
 0xd85   :  { %765 = vrot.lane.b32.xlu2 %v762_v49, %s2481_s22  ;;  %1940 = vmatmul.msk.f32.vlgmr.msra.gmra.mxu3 %vm983_vm6, %v981_v48  ;;  %v941_v49 = vld [vmem:[#allocation7] sm:$0x1]  ;;  %1032 = vst [vmem:[#allocation22] sm:$0xff] %v2483_v4 }
 0xd86   :  { %962 = vmatpush.msra.mxu1 %v937_v43 }
 0xddf   :  { %v766_v50 = vpop.permute.xlu2 %765 }
 0xde0   :  { %1933 = vmatmul.msk.f32.vlgmr.msrb.gmra.mxu1 %vm241_vm1, %v766_v50 }
 0xe5d   :  { %v786_v52 = vpop.f32.mrf.mxu1 }
 0xe5e   :  { %v810_v53 = vadd.f32 %v809_v51, %v786_v52 }
 0xe60   :  { %v812_v54 = vadd.f32 %v810_v53, %v2700_v10 }
 0xe62   :  { %2038 = vtanh.f32 %v812_v54  ;;  %v1935_v56 = vmul.f32 -1.442695, %v812_v54 }
 0xe64   :  { %2040 = vpow2.f32 %v1935_v56  ;;  %v2788_v56 = vld [vmem:[%s2972_s13 + $0x18] sm:$0xff] }
 0xe65   :  { %1055 = vmatpush.msra.mxu2 %v2788_v56 }
 0xe68   :  { %v2039_v55 = vpop.eup %2038 }
 0xe69   :  { %835 = vrot.lane.b32.xlu0 %v2039_v55, %s2480_s1  ;;  %v979_v55 = vld [vmem:[#allocation11] sm:$0xff] }
 0xe6a   :  { %v2041_v57 = vpop.eup %2040  ;;  %1025 = vmatpush.msra.mxu0 %v979_v55 }
 0xe6b   :  { %v816_v58 = vadd.f32 1.0, %v2041_v57  ;;  %v2793_v57 = vld [vmem:[%s2972_s13 + $0x10] sm:$0xff] }
 0xe6c   :  { %1056 = vmatpush.msra.mxu2 %v2793_v57 }
 0xe6d   :  { %2042 = vrcp.f32 %v816_v58  ;;  %v828_v5 = vand.u32 2147483648, %v816_v58  ;;  %vm822_vm13 = vweird.f32 %v816_v58  ;;  %v826_v7 = vand.u32 2147483647, %v816_v58 }
 0xe6f   :  { %v829_v9 = vor.u32 1.1754944e-38, %v828_v5  ;;  %vm827_vm15 = vcmp.eq.f32.partialorder %v826_v7, 8.507059e+37  ;;  %v2812_v5 = vld [vmem:[#allocation16 + $0x8] sm:$0xff]  ;;  %v2816_v7 = vld [vmem:[#allocation16] sm:$0xff] }
 0xe70   :  { %1080 = vmatpush.msrb.mxu1 %v2812_v5 }
 0xe72   :  { %1081 = vmatpush.msrb.mxu1 %v2816_v7 }
 0xe73   :  { %v2043_v59 = vpop.eup %2042 }
 0xe74   :  { %v818_v60 = vmul.f32 %v2043_v59, %v816_v58  ;;  %vm823_vm12 = vweird.f32 %v2043_v59  ;;  %v969_v58 = vld [vmem:[#allocation8] sm:$0x1] }
 0xe75   :  { %vm824_vm14 = vmor %vm822_vm13, %vm823_vm12 }
 0xe76   :  { %v819_v61 = vsub.f32 1.0, %v818_v60 }
 0xe78   :  { %v820_v62 = vmul.f32 %v2043_v59, %v819_v61 }
 0xe7a   :  { %v821_v63 = vadd.f32 %v2043_v59, %v820_v62  ;;  %v2803_v62 = vld [vmem:[%s2972_s13 + $0x8] sm:$0xff] }
 0xe7b   :  { %1057 = vmatpush.msra.mxu2 %v2803_v62 }
 0xe7c   :  { %v825_v8 = vsel %vm824_vm14, %v2043_v59, %v821_v63  ;;  %v2810_v63 = vld [vmem:[%s2972_s13] sm:$0xff] }
 0xe7d   :  { %v830_v12 = vsel %vm827_vm15, %v829_v9, %v825_v8  ;;  %1058 = vmatpush.msra.mxu2 %v2810_v63  ;;  %v1033_v8 = vld [vmem:[#allocation20] sm:$0x1]  ;;  %v1004_v9 = vpop.f32.mrf.mxu3 }
 0xe7e   :  { %v833_v14 = vmul.f32 %v830_v12, %v756_v45 }
 0xe7f   :  { %1200 = vmatpush.msrb.mxu2 %v2812_v5 }
 0xe81   :  { %1201 = vmatpush.msrb.mxu2 %v2816_v7 }
 0xedb   :  { %v836_v11 = vpop.permute.xlu0 %835 }
 0xedc   :  { %v838_v13 = vmul.f32 %v836_v11, %v830_v12 }
 0xede   :  { %840 = vrot.lane.b32.xlu1 %v838_v13, %s2481_s22 }
 0xf50   :  { %v841_v15 = vpop.permute.xlu1 %840 }
 0xf51   :  { %v843_v16 = vadd.f32 %v841_v15, %v833_v14 }
 0xf53   :  { %2044 = vtanh.f32 %v843_v16 }
 0xf59   :  { %v2045_v17 = vpop.eup %2044 }
 0xf5a   :  { %846 = vrot.lane.b32.xlu2 %v2045_v17, %s2480_s1  ;;  %v1086_v17 = vld [vmem:[#allocation17] sm:$0x1] }
 0xfb4   :  { %v847_v19 = vpop.permute.xlu2 %846 }
 0xfb5   :  { %v849_v20 = vmul.f32 %v847_v19, %v830_v12  ;;  %v1030_v12 = vld [vmem:[#allocation14] sm:$0x1] }
 0xfb7   :  { %852 = vrot.lane.b32.xlu0 %v849_v20, %s2481_s22 }
0x1029   :  { %v853_v21 = vpop.permute.xlu0 %852 }
0x102a   :  { %1936 = vmatmul.msk.f32.vlgmr.msrb.gmra.mxu0 %vm241_vm1, %v853_v21 }
0x102b   :  { %1175 = vmatpush.msrb.mxu0 %v2788_v56 }
0x102d   :  { %1176 = vmatpush.msrb.mxu0 %v2793_v57 }
0x102f   :  { %1177 = vmatpush.msrb.mxu0 %v2803_v62 }
0x1031   :  { %1178 = vmatpush.msrb.mxu0 %v2810_v63 }
0x10a7   :  { %v873_v23 = vpop.f32.mrf.mxu0 }
0x10a8   :  { %v897_v24 = vadd.f32 %v896_v22, %v873_v23 }
0x10aa   :  { %v899_v25 = vadd.f32 %v897_v24, %v2700_v10 }
0x10ac   :  { %2046 = vtanh.f32 %v899_v25  ;;  %v1938_v27 = vmul.f32 -1.442695, %v899_v25 }
0x10ae   :  { %2048 = vpow2.f32 %v1938_v27 }
0x10b2   :  { %v2047_v26 = vpop.eup %2046 }
0x10b3   :  { %922 = vrot.lane.b32.xlu1 %v2047_v26, %s2480_s1 }
0x10b4   :  { %v2049_v28 = vpop.eup %2048 }
0x10b5   :  { %v903_v29 = vadd.f32 1.0, %v2049_v28 }
0x10b7   :  { %2050 = vrcp.f32 %v903_v29  ;;  %v915_v35 = vand.u32 2147483648, %v903_v29  ;;  %vm909_vm3 = vweird.f32 %v903_v29  ;;  %v913_v36 = vand.u32 2147483647, %v903_v29 }
0x10b9   :  { %v916_v37 = vor.u32 1.1754944e-38, %v915_v35  ;;  %vm914_vm5 = vcmp.eq.f32.partialorder %v913_v36, 8.507059e+37 }
0x10bd   :  { %v2051_v30 = vpop.eup %2050 }
0x10be   :  { %v905_v31 = vmul.f32 %v2051_v30, %v903_v29  ;;  %vm910_vm2 = vweird.f32 %v2051_v30 }
0x10bf   :  { %vm911_vm4 = vmor %vm909_vm3, %vm910_vm2 }
0x10c0   :  { %v906_v32 = vsub.f32 1.0, %v905_v31 }
0x10c2   :  { %v907_v33 = vmul.f32 %v2051_v30, %v906_v32 }
0x10c4   :  { %v908_v34 = vadd.f32 %v2051_v30, %v907_v33 }
0x10c6   :  { %v912_v10 = vsel %vm911_vm4, %v2051_v30, %v908_v34 }
0x10c7   :  { %v917_v3 = vsel %vm914_vm5, %v916_v37, %v912_v10 }
0x10c8   :  { %v920_v39 = vmul.f32 %v917_v3, %v843_v16 }
0x1125   :  { %v923_v2 = vpop.permute.xlu1 %922 }
0x1126   :  { %v925_v38 = vmul.f32 %v923_v2, %v917_v3 }
0x1128   :  { %927 = vrot.lane.b32.xlu2 %v925_v38, %s2481_s22  ;;  %v1156_v38 = vld [vmem:[#allocation20 + $0x1] sm:$0x1] }
0x1182   :  { %v928_v40 = vpop.permute.xlu2 %927 }
0x1183   :  { %v930_v41 = vadd.f32 %v928_v40, %v920_v39  ;;  %v2840_v39 = vld [vmem:[%s2974_s15 + $0x10] sm:$0xff]  ;;  %v2847_v40 = vld [vmem:[%s2974_s15 + $0x8] sm:$0xff] }
0x1185   :  { %2052 = vtanh.f32 %v930_v41  ;;  %v2855_v41 = vld [vmem:[%s2974_s15] sm:$0xff] }
0x118b   :  { %v2053_v0 = vpop.eup %2052 }
0x118c   :  { %933 = vrot.lane.b32.xlu0 %v2053_v0, %s2480_s1 }
0x11fe   :  { %v934_v6 = vpop.permute.xlu0 %933 }
0x11ff   :  { %v936_v44 = vmul.f32 %v934_v6, %v917_v3  ;;  %v2835_v3 = vld [vmem:[%s2974_s15 + $0x18] sm:$0xff]  ;;  %s2484_s15 = smov [#allocation23]  }
0x1200   :  { %1147 = vmatpush.msrb.mxu3 %v2835_v3  ;;  %s1892_s21 = sshll.u32 %s2484_s15, 4  ;;  %s1893_s21 = int_to_ptr.vmem [resolvable:$true] %s1892_s21 }
0x1201   :  { %943 = vrot.lane.b32.xlu1 %v936_v44, %s2481_s22  ;;  %v1206_v44 = vld [vmem:[#allocation17] sm:$0x1] }
0x1202   :  { %1148 = vmatpush.msrb.mxu3 %v2840_v39 }
0x1204   :  { %1149 = vmatpush.msrb.mxu3 %v2847_v40 }
0x1206   :  { %1150 = vmatpush.msrb.mxu3 %v2855_v41 }
0x1208   :  { %1295 = vmatpush.msra.mxu3 %v2788_v56 }
0x120a   :  { %1296 = vmatpush.msra.mxu3 %v2793_v57 }
0x120c   :  { %1297 = vmatpush.msra.mxu3 %v2803_v62 }
0x120e   :  { %1298 = vmatpush.msra.mxu3 %v2810_v63 }
0x1273   :  { %v944_v45 = vpop.permute.xlu1 %943 }
0x1274   :  { %1939 = vmatmul.msk.f32.vlgmr.msra.gmra.mxu1 %vm241_vm1, %v944_v45 }
0x1275   :  { %1267 = vmatpush.msra.mxu1 %v2835_v3 }
0x1277   :  { %1268 = vmatpush.msra.mxu1 %v2840_v39 }
0x1279   :  { %1269 = vmatpush.msra.mxu1 %v2847_v40 }
0x127b   :  { %1270 = vmatpush.msra.mxu1 %v2855_v41 }
0x127c   :  { %1943 = vmatmul.msk.f32.vlgmr.msrb.gmra.mxu1 %vm265_vm0, %v1033_v8 }
0x127d   :  { %1415 = vmatpush.msrb.mxu1 %v2788_v56 }
0x127f   :  { %1416 = vmatpush.msrb.mxu1 %v2793_v57 }
0x1281   :  { %1417 = vmatpush.msrb.mxu1 %v2803_v62 }
0x1283   :  { %1418 = vmatpush.msrb.mxu1 %v2810_v63 }
0x12f1   :  { %v964_v50 = vpop.f32.mrf.mxu1 }
0x12f2   :  { %v965_v51 = vadd.f32 %v964_v50, %v941_v49 }
0x12f4   :  { %v970_v52 = vmul.f32 0.5, %v965_v51  ;;  %968 = vst.msk [vmem:[#allocation23] sm:$0x1] %vm967_vm7, %v965_v51 }
0x12f5   :  { %1897 = dma.vmem_to_hbm [thread:$0]  %s1893_s21, 16, %s1895_s12, [#allocation24]  }
0x12f6   :  { %v971_v53 = vmul.f32 1.442695, %v970_v52 }
0x12f8   :  { %2054 = vpow2.f32 %v971_v53 }
0x12f9   :  { %v1083_v15 = vpop.f32.mrf.mxu1 }
0x12fe   :  { %v2055_v54 = vpop.eup %2054 }
0x12ff   :  { %974 = vrot.lane.b32.xlu2 %v2055_v54, %s2482_s5 }
0x1359   :  { %v975_v59 = vpop.permute.xlu2 %974 }
0x135a   :  { %v977_v60 = vmul.f32 %v975_v59, %v969_v58 }
0x135c   :  { %v978_v61 = vadd.f32 %v977_v60, %v965_v51 }
0x135e   :  { %1941 = vmatmul.msk.f32.vlgmr.msra.gmra.mxu0 %vm265_vm0, %v978_v61 }
0x135f   :  { %1320 = vmatpush.msra.mxu0 %v2812_v5 }
0x1361   :  { %1321 = vmatpush.msra.mxu0 %v2816_v7 }
0x13db   :  { %v1027_v11 = vpop.f32.mrf.mxu0 }
0x13dc   :  { %v1028_v13 = vadd.f32 %v1027_v11, %v1004_v9 }
0x13de   :  { %v1031_v14 = vadd.f32 %v1030_v12, %v1028_v13 }
0x13e0   :  { %1942 = vmatmul.msk.f32.vlgmr.msra.gmra.mxu2 %vm241_vm1, %v1031_v14 }
0x13e1   :  { %1387 = vmatpush.msra.mxu2 %v2835_v3 }
0x13e3   :  { %1388 = vmatpush.msra.mxu2 %v2840_v39 }
0x13e5   :  { %1389 = vmatpush.msra.mxu2 %v2847_v40 }
0x13e7   :  { %1390 = vmatpush.msra.mxu2 %v2855_v41 }
0x13e8   :  { %1947 = vmatmul.msk.f32.vlgmr.msrb.gmra.mxu2 %vm265_vm0, %v1156_v38 }
0x13e9   :  { %1535 = vmatpush.msrb.mxu2 %v2788_v56 }
0x13eb   :  { %1536 = vmatpush.msrb.mxu2 %v2793_v57 }
0x13ed   :  { %1537 = vmatpush.msrb.mxu2 %v2803_v62 }
0x13ef   :  { %1538 = vmatpush.msrb.mxu2 %v2810_v63 }
0x1463   :  { %v1060_v16 = vpop.f32.mrf.mxu2 }
0x1464   :  { %v1084_v18 = vadd.f32 %v1083_v15, %v1060_v16 }
0x1466   :  { %v1087_v19 = vadd.f32 %v1086_v17, %v1084_v18 }
0x1468   :  { %2056 = vtanh.f32 %v1087_v19  ;;  %v1944_v21 = vmul.f32 -1.442695, %v1087_v19 }
0x146a   :  { %2058 = vpow2.f32 %v1944_v21  ;;  %v1276_v21 = vld [vmem:[#allocation20 + $0x2] sm:$0x1] }
0x146b   :  { %v1203_v43 = vpop.f32.mrf.mxu2 }
0x146e   :  { %v2057_v20 = vpop.eup %2056 }
0x146f   :  { %1110 = vrot.lane.b32.xlu0 %v2057_v20, %s2480_s1 }
0x1470   :  { %v2059_v22 = vpop.eup %2058 }
0x1471   :  { %v1091_v23 = vadd.f32 1.0, %v2059_v22 }
0x1473   :  { %2060 = vrcp.f32 %v1091_v23  ;;  %v1103_v29 = vand.u32 2147483648, %v1091_v23  ;;  %vm1097_vm9 = vweird.f32 %v1091_v23  ;;  %v1101_v30 = vand.u32 2147483647, %v1091_v23 }
0x1475   :  { %v1104_v32 = vor.u32 1.1754944e-38, %v1103_v29  ;;  %vm1102_vm11 = vcmp.eq.f32.partialorder %v1101_v30, 8.507059e+37 }
0x1479   :  { %v2061_v24 = vpop.eup %2060 }
0x147a   :  { %v1093_v25 = vmul.f32 %v2061_v24, %v1091_v23  ;;  %vm1098_vm8 = vweird.f32 %v2061_v24  ;;  %v1249_v23 = vld [vmem:[#allocation19] sm:$0x1] }
0x147b   :  { %vm1099_vm10 = vmor %vm1097_vm9, %vm1098_vm8 }
0x147c   :  { %v1094_v26 = vsub.f32 1.0, %v1093_v25 }
0x147e   :  { %v1095_v27 = vmul.f32 %v2061_v24, %v1094_v26 }
0x1480   :  { %v1096_v28 = vadd.f32 %v2061_v24, %v1095_v27 }
0x1482   :  { %v1100_v31 = vsel %vm1099_vm10, %v2061_v24, %v1096_v28  ;;  %v1326_v28 = vld [vmem:[#allocation17] sm:$0x1] }
0x1483   :  { %v1105_v34 = vsel %vm1102_vm11, %v1104_v32, %v1100_v31 }
0x1484   :  { %v1108_v36 = vmul.f32 0.0, %v1105_v34 }
0x14e1   :  { %v1111_v33 = vpop.permute.xlu0 %1110 }
0x14e2   :  { %v1113_v35 = vmul.f32 %v1111_v33, %v1105_v34 }
0x14e4   :  { %1115 = vrot.lane.b32.xlu1 %v1113_v35, %s2481_s22 }
0x1556   :  { %v1116_v10 = vpop.permute.xlu1 %1115 }
0x1557   :  { %v2828_v37 = vadd.f32 %v1116_v10, %v1108_v36 }
0x1559   :  { %2062 = vtanh.f32 %v2828_v37 }
0x155f   :  { %v2063_v2 = vpop.eup %2062 }
0x1560   :  { %1121 = vrot.lane.b32.xlu2 %v2063_v2, %s2480_s1 }
0x15ba   :  { %v1122_v0 = vpop.permute.xlu2 %1121 }
0x15bb   :  { %v1124_v1 = vmul.f32 %v1122_v0, %v1105_v34 }
0x15bd   :  { %1131 = vrot.lane.b32.xlu0 %v1124_v1, %s2481_s22 }
0x162f   :  { %v1132_v42 = vpop.permute.xlu0 %1131 }
0x1630   :  { %1945 = vmatmul.msk.f32.vlgmr.msrb.gmra.mxu3 %vm241_vm1, %v1132_v42  ;;  %1946 = vmatmul.msk.f32.vlgmr.msrb.gmra.mxu0 %vm241_vm1, %v1132_v42 }
0x1631   :  { %1440 = vmatpush.msrb.mxu3 %v2812_v5  ;;  %1507 = vmatpush.msrb.mxu0 %v2835_v3 }
0x1633   :  { %1441 = vmatpush.msrb.mxu3 %v2816_v7  ;;  %1508 = vmatpush.msrb.mxu0 %v2840_v39 }
0x1635   :  { %1509 = vmatpush.msrb.mxu0 %v2847_v40 }
0x1637   :  { %1510 = vmatpush.msrb.mxu0 %v2855_v41 }
0x1638   :  { %1951 = vmatmul.msk.f32.vlgmr.msra.gmra.mxu0 %vm265_vm0, %v1276_v21 }
0x1639   :  { %1655 = vmatpush.msra.mxu0 %v2788_v56 }
0x163b   :  { %1656 = vmatpush.msra.mxu0 %v2793_v57 }
0x163d   :  { %1657 = vmatpush.msra.mxu0 %v2803_v62 }
0x163f   :  { %1658 = vmatpush.msra.mxu0 %v2810_v63 }
0x16ad   :  { %v1180_v6 = vpop.f32.mrf.mxu0 }
0x16ae   :  { %v1204_v45 = vadd.f32 %v1203_v43, %v1180_v6 }
0x16b0   :  { %v1207_v46 = vadd.f32 %v1206_v44, %v1204_v45 }
0x16b2   :  { %2064 = vtanh.f32 %v1207_v46  ;;  %v1948_v51 = vmul.f32 -1.442695, %v1207_v46 }
0x16b3   :  { %v1152_v48 = vpop.f32.mrf.mxu3 }
0x16b4   :  { %v1153_v49 = vadd.f32 %v1152_v48, %v1129_v47  ;;  %2066 = vpow2.f32 %v1948_v51  ;;  %v1396_v48 = vld [vmem:[#allocation20 + $0x3] sm:$0x1] }
0x16b5   :  { %v1323_v26 = vpop.f32.mrf.mxu0 }
0x16b6   :  { %1155 = vst [vmem:[#allocation22 + $0x1] sm:$0x1] %v1153_v49 }
0x16b8   :  { %v2065_v50 = vpop.eup %2064 }
0x16b9   :  { %1230 = vrot.lane.b32.xlu1 %v2065_v50, %s2480_s1 }
0x16ba   :  { %v2067_v52 = vpop.eup %2066 }
0x16bb   :  { %v1211_v53 = vadd.f32 1.0, %v2067_v52 }
0x16bd   :  { %2068 = vrcp.f32 %v1211_v53  ;;  %v1223_v61 = vand.u32 2147483648, %v1211_v53  ;;  %vm1217_vm13 = vweird.f32 %v1211_v53  ;;  %v1221_v8 = vand.u32 2147483647, %v1211_v53 }
0x16bf   :  { %v1224_v11 = vor.u32 1.1754944e-38, %v1223_v61  ;;  %vm1222_vm15 = vcmp.eq.f32.partialorder %v1221_v8, 8.507059e+37 }
0x16c3   :  { %v2069_v54 = vpop.eup %2068 }
0x16c4   :  { %v1213_v55 = vmul.f32 %v2069_v54, %v1211_v53  ;;  %vm1218_vm12 = vweird.f32 %v2069_v54  ;;  %v1369_v53 = vld [vmem:[#allocation19] sm:$0x1] }
0x16c5   :  { %vm1219_vm14 = vmor %vm1217_vm13, %vm1218_vm12 }
0x16c6   :  { %v1214_v58 = vsub.f32 1.0, %v1213_v55 }
0x16c8   :  { %v1215_v59 = vmul.f32 %v2069_v54, %v1214_v58 }
0x16ca   :  { %v1216_v60 = vadd.f32 %v2069_v54, %v1215_v59 }
0x16cc   :  { %v1220_v9 = vsel %vm1219_vm14, %v2069_v54, %v1216_v60 }
0x16cd   :  { %v1225_v13 = vsel %vm1222_vm15, %v1224_v11, %v1220_v9 }
0x16ce   :  { %v1228_v15 = vmul.f32 %v1225_v13, %v2828_v37 }
0x172b   :  { %v1231_v12 = vpop.permute.xlu1 %1230 }
0x172c   :  { %v1233_v14 = vmul.f32 %v1231_v12, %v1225_v13 }
0x172e   :  { %1235 = vrot.lane.b32.xlu2 %v1233_v14, %s2481_s22 }
0x1788   :  { %v1236_v16 = vpop.permute.xlu2 %1235 }
0x1789   :  { %v1238_v17 = vadd.f32 %v1236_v16, %v1228_v15 }
0x178b   :  { %2070 = vtanh.f32 %v1238_v17 }
0x1791   :  { %v2071_v18 = vpop.eup %2070 }
0x1792   :  { %1241 = vrot.lane.b32.xlu0 %v2071_v18, %s2480_s1 }
0x1804   :  { %v1242_v19 = vpop.permute.xlu0 %1241 }
0x1805   :  { %v1244_v20 = vmul.f32 %v1242_v19, %v1225_v13 }
0x1807   :  { %1251 = vrot.lane.b32.xlu1 %v1244_v20, %s2481_s22 }
0x1879   :  { %v1252_v22 = vpop.permute.xlu1 %1251 }
0x187a   :  { %1949 = vmatmul.msk.f32.vlgmr.msra.gmra.mxu1 %vm241_vm1, %v1252_v22  ;;  %1950 = vmatmul.msk.f32.vlgmr.msra.gmra.mxu3 %vm241_vm1, %v1252_v22 }
0x187b   :  { %1560 = vmatpush.msra.mxu1 %v2812_v5  ;;  %1627 = vmatpush.msra.mxu3 %v2835_v3 }
0x187d   :  { %1561 = vmatpush.msra.mxu1 %v2816_v7  ;;  %1628 = vmatpush.msra.mxu3 %v2840_v39 }
0x187f   :  { %1629 = vmatpush.msra.mxu3 %v2847_v40 }
0x1881   :  { %1630 = vmatpush.msra.mxu3 %v2855_v41 }
0x1882   :  { %1955 = vmatmul.msk.f32.vlgmr.msrb.gmra.mxu3 %vm265_vm0, %v1396_v48  ;;  %v1636_v48 = vld [vmem:[#allocation20 + $0x5] sm:$0x1] }
0x1883   :  { %1775 = vmatpush.msrb.mxu3 %v2788_v56 }
0x1885   :  { %1776 = vmatpush.msrb.mxu3 %v2793_v57 }
0x1887   :  { %1777 = vmatpush.msrb.mxu3 %v2803_v62  ;;  %v1446_v62 = vld [vmem:[#allocation17] sm:$0x1] }
0x1889   :  { %1778 = vmatpush.msrb.mxu3 %v2810_v63 }
0x18f7   :  { %v1272_v24 = vpop.f32.mrf.mxu1 }
0x18f8   :  { %v1273_v25 = vadd.f32 %v1272_v24, %v1249_v23 }
0x18fa   :  { %1275 = vst [vmem:[#allocation22 + $0x2] sm:$0x1] %v1273_v25 }
0x18fd   :  { %v1300_v27 = vpop.f32.mrf.mxu3 }
0x18fe   :  { %v1324_v29 = vadd.f32 %v1323_v26, %v1300_v27  ;;  %v1516_v27 = vld [vmem:[#allocation20 + $0x4] sm:$0x1] }
0x1900   :  { %v1327_v30 = vadd.f32 %v1326_v28, %v1324_v29  ;;  %v1489_v29 = vld [vmem:[#allocation19] sm:$0x1] }
0x1902   :  { %2072 = vtanh.f32 %v1327_v30  ;;  %v1952_v32 = vmul.f32 -1.442695, %v1327_v30 }
0x1904   :  { %2074 = vpow2.f32 %v1952_v32 }
0x1905   :  { %v1443_v56 = vpop.f32.mrf.mxu3 }
0x1908   :  { %v2073_v31 = vpop.eup %2072 }
0x1909   :  { %1350 = vrot.lane.b32.xlu2 %v2073_v31, %s2480_s1 }
0x190a   :  { %v2075_v33 = vpop.eup %2074 }
0x190b   :  { %v1331_v34 = vadd.f32 1.0, %v2075_v33 }
0x190d   :  { %2076 = vrcp.f32 %v1331_v34  ;;  %v1343_v38 = vand.u32 2147483648, %v1331_v34  ;;  %vm1337_vm3 = vweird.f32 %v1331_v34  ;;  %v1341_v0 = vand.u32 2147483647, %v1331_v34 }
0x190f   :  { %v1344_v42 = vor.u32 1.1754944e-38, %v1343_v38  ;;  %vm1342_vm5 = vcmp.eq.f32.partialorder %v1341_v0, 8.507059e+37 }
0x1913   :  { %v2077_v35 = vpop.eup %2076 }
0x1914   :  { %v1333_v36 = vmul.f32 %v2077_v35, %v1331_v34  ;;  %vm1338_vm2 = vweird.f32 %v2077_v35  ;;  %v1566_v34 = vld [vmem:[#allocation17] sm:$0x1] }
0x1915   :  { %vm1339_vm4 = vmor %vm1337_vm3, %vm1338_vm2 }
0x1916   :  { %v1334_v10 = vsub.f32 1.0, %v1333_v36 }
0x1918   :  { %v1335_v37 = vmul.f32 %v2077_v35, %v1334_v10 }
0x191a   :  { %v1336_v2 = vadd.f32 %v2077_v35, %v1335_v37 }
0x191c   :  { %v1340_v1 = vsel %vm1339_vm4, %v2077_v35, %v1336_v2 }
0x191d   :  { %v1345_v43 = vsel %vm1342_vm5, %v1344_v42, %v1340_v1 }
0x191e   :  { %v1348_v44 = vmul.f32 %v1345_v43, %v1238_v17 }
0x1963   :  { %v1351_v4 = vpop.permute.xlu2 %1350 }
0x1964   :  { %v1353_v6 = vmul.f32 %v1351_v4, %v1345_v43 }
0x1966   :  { %1355 = vrot.lane.b32.xlu0 %v1353_v6, %s2481_s22 }
0x19d8   :  { %v1356_v45 = vpop.permute.xlu0 %1355 }
0x19d9   :  { %v1358_v46 = vadd.f32 %v1356_v45, %v1348_v44 }
0x19db   :  { %2078 = vtanh.f32 %v1358_v46 }
0x19e1   :  { %v2079_v47 = vpop.eup %2078 }
0x19e2   :  { %1361 = vrot.lane.b32.xlu1 %v2079_v47, %s2480_s1 }
0x1a54   :  { %v1362_v49 = vpop.permute.xlu1 %1361 }
0x1a55   :  { %v1364_v50 = vmul.f32 %v1362_v49, %v1345_v43 }
0x1a57   :  { %1371 = vrot.lane.b32.xlu2 %v1364_v50, %s2481_s22 }
0x1ab1   :  { %v1372_v51 = vpop.permute.xlu2 %1371 }
0x1ab2   :  { %1953 = vmatmul.msk.f32.vlgmr.msra.gmra.mxu2 %vm241_vm1, %v1372_v51  ;;  %1954 = vmatmul.msk.f32.vlgmr.msrb.gmra.mxu1 %vm241_vm1, %v1372_v51 }
0x1ab3   :  { %1680 = vmatpush.msra.mxu2 %v2812_v5  ;;  %1747 = vmatpush.msrb.mxu1 %v2835_v3 }
0x1ab5   :  { %1681 = vmatpush.msra.mxu2 %v2816_v7  ;;  %1748 = vmatpush.msrb.mxu1 %v2840_v39 }
0x1ab7   :  { %1749 = vmatpush.msrb.mxu1 %v2847_v40 }
0x1ab9   :  { %1750 = vmatpush.msrb.mxu1 %v2855_v41 }
0x1aba   :  { %1959 = vmatmul.msk.f32.vlgmr.msra.gmra.mxu1 %vm265_vm0, %v1516_v27  ;;  %v1756_v27 = vld [vmem:[#allocation20 + $0x6] sm:$0x1] }
0x1b2f   :  { %v1420_v57 = vpop.f32.mrf.mxu1 }
0x1b30   :  { %v1444_v63 = vadd.f32 %v1443_v56, %v1420_v57 }
0x1b32   :  { %v1447_v52 = vadd.f32 %v1446_v62, %v1444_v63  ;;  %v1686_v62 = vld [vmem:[#allocation17] sm:$0x1] }
0x1b34   :  { %2080 = vtanh.f32 %v1447_v52  ;;  %v1956_v59 = vmul.f32 -1.442695, %v1447_v52 }
0x1b35   :  { %v1392_v54 = vpop.f32.mrf.mxu2 }
0x1b36   :  { %v1393_v55 = vadd.f32 %v1392_v54, %v1369_v53  ;;  %2082 = vpow2.f32 %v1956_v59  ;;  %v1609_v53 = vld [vmem:[#allocation19] sm:$0x1] }
0x1b37   :  { %v1563_v32 = vpop.f32.mrf.mxu1 }
0x1b38   :  { %1395 = vst [vmem:[#allocation22 + $0x3] sm:$0x1] %v1393_v55 }
0x1b3a   :  { %v2081_v58 = vpop.eup %2080 }
0x1b3b   :  { %1470 = vrot.lane.b32.xlu0 %v2081_v58, %s2480_s1 }
0x1b3c   :  { %v2083_v60 = vpop.eup %2082 }
0x1b3d   :  { %v1451_v61 = vadd.f32 1.0, %v2083_v60 }
0x1b3f   :  { %2084 = vrcp.f32 %v1451_v61  ;;  %v1463_v14 = vand.u32 2147483648, %v1451_v61  ;;  %vm1457_vm7 = vweird.f32 %v1451_v61  ;;  %v1461_v15 = vand.u32 2147483647, %v1451_v61 }
0x1b41   :  { %v1464_v17 = vor.u32 1.1754944e-38, %v1463_v14  ;;  %vm1462_vm9 = vcmp.eq.f32.partialorder %v1461_v15, 8.507059e+37 }
0x1b45   :  { %v2085_v8 = vpop.eup %2084 }
0x1b46   :  { %v1453_v9 = vmul.f32 %v2085_v8, %v1451_v61  ;;  %vm1458_vm6 = vweird.f32 %v2085_v8 }
0x1b47   :  { %vm1459_vm8 = vmor %vm1457_vm7, %vm1458_vm6 }
0x1b48   :  { %v1454_v11 = vsub.f32 1.0, %v1453_v9 }
0x1b4a   :  { %v1455_v12 = vmul.f32 %v2085_v8, %v1454_v11 }
0x1b4c   :  { %v1456_v13 = vadd.f32 %v2085_v8, %v1455_v12 }
0x1b4e   :  { %v1460_v16 = vsel %vm1459_vm8, %v2085_v8, %v1456_v13 }
0x1b4f   :  { %v1465_v19 = vsel %vm1462_vm9, %v1464_v17, %v1460_v16 }
0x1b50   :  { %v1468_v21 = vmul.f32 %v1465_v19, %v1358_v46 }
0x1bad   :  { %v1471_v18 = vpop.permute.xlu0 %1470 }
0x1bae   :  { %v1473_v20 = vmul.f32 %v1471_v18, %v1465_v19 }
0x1bb0   :  { %1475 = vrot.lane.b32.xlu1 %v1473_v20, %s2481_s22 }
0x1c22   :  { %v1476_v22 = vpop.permute.xlu1 %1475 }
0x1c23   :  { %v1478_v23 = vadd.f32 %v1476_v22, %v1468_v21 }
0x1c25   :  { %2086 = vtanh.f32 %v1478_v23 }
0x1c2b   :  { %v2087_v24 = vpop.eup %2086 }
0x1c2c   :  { %1481 = vrot.lane.b32.xlu2 %v2087_v24, %s2480_s1 }
0x1c86   :  { %v1482_v25 = vpop.permute.xlu2 %1481 }
0x1c87   :  { %v1484_v26 = vmul.f32 %v1482_v25, %v1465_v19 }
0x1c89   :  { %1491 = vrot.lane.b32.xlu0 %v1484_v26, %s2481_s22 }
0x1cfb   :  { %v1492_v28 = vpop.permute.xlu0 %1491 }
0x1cfc   :  { %1957 = vmatmul.msk.f32.vlgmr.msrb.gmra.mxu0 %vm241_vm1, %v1492_v28  ;;  %1958 = vmatmul.msk.f32.vlgmr.msrb.gmra.mxu2 %vm241_vm1, %v1492_v28 }
0x1cfd   :  { %1800 = vmatpush.msrb.mxu0 %v2812_v5  ;;  %1867 = vmatpush.msrb.mxu2 %v2835_v3 }
0x1cff   :  { %1801 = vmatpush.msrb.mxu0 %v2816_v7  ;;  %1868 = vmatpush.msrb.mxu2 %v2840_v39 }
0x1d01   :  { %1869 = vmatpush.msrb.mxu2 %v2847_v40 }
0x1d03   :  { %1870 = vmatpush.msrb.mxu2 %v2855_v41 }
0x1d04   :  { %1963 = vmatmul.msk.f32.vlgmr.msra.gmra.mxu2 %vm265_vm0, %v1636_v48 }
0x1d79   :  { %v1512_v30 = vpop.f32.mrf.mxu0 }
0x1d7a   :  { %v1513_v31 = vadd.f32 %v1512_v30, %v1489_v29  ;;  %v1729_v29 = vld [vmem:[#allocation19] sm:$0x1] }
0x1d7c   :  { %1515 = vst [vmem:[#allocation22 + $0x4] sm:$0x1] %v1513_v31 }
0x1d7f   :  { %v1540_v33 = vpop.f32.mrf.mxu2 }
0x1d80   :  { %v1564_v35 = vadd.f32 %v1563_v32, %v1540_v33 }
0x1d82   :  { %v1567_v36 = vadd.f32 %v1566_v34, %v1564_v35  ;;  %v1806_v34 = vld [vmem:[#allocation17] sm:$0x1] }
0x1d84   :  { %2088 = vtanh.f32 %v1567_v36  ;;  %v1960_v7 = vmul.f32 -1.442695, %v1567_v36 }
0x1d86   :  { %2090 = vpow2.f32 %v1960_v7 }
0x1d87   :  { %v1683_v56 = vpop.f32.mrf.mxu2 }
0x1d8a   :  { %v2089_v5 = vpop.eup %2088 }
0x1d8b   :  { %1590 = vrot.lane.b32.xlu1 %v2089_v5, %s2480_s1 }
0x1d8c   :  { %v2091_v3 = vpop.eup %2090 }
0x1d8d   :  { %v1571_v39 = vadd.f32 1.0, %v2091_v3 }
0x1d8f   :  { %2092 = vrcp.f32 %v1571_v39  ;;  %v1583_v38 = vand.u32 2147483648, %v1571_v39  ;;  %vm1577_vm11 = vweird.f32 %v1571_v39  ;;  %v1581_v0 = vand.u32 2147483647, %v1571_v39 }
0x1d91   :  { %v1584_v42 = vor.u32 1.1754944e-38, %v1583_v38  ;;  %vm1582_vm13 = vcmp.eq.f32.partialorder %v1581_v0, 8.507059e+37 }
0x1d95   :  { %v2093_v40 = vpop.eup %2092 }
0x1d96   :  { %v1573_v41 = vmul.f32 %v2093_v40, %v1571_v39  ;;  %vm1578_vm10 = vweird.f32 %v2093_v40 }
0x1d97   :  { %vm1579_vm12 = vmor %vm1577_vm11, %vm1578_vm10 }
0x1d98   :  { %v1574_v10 = vsub.f32 1.0, %v1573_v41 }
0x1d9a   :  { %v1575_v37 = vmul.f32 %v2093_v40, %v1574_v10 }
0x1d9c   :  { %v1576_v2 = vadd.f32 %v2093_v40, %v1575_v37 }
0x1d9e   :  { %v1580_v1 = vsel %vm1579_vm12, %v2093_v40, %v1576_v2 }
0x1d9f   :  { %v1585_v43 = vsel %vm1582_vm13, %v1584_v42, %v1580_v1 }
0x1da0   :  { %v1588_v44 = vmul.f32 %v1585_v43, %v1478_v23 }
0x1dfd   :  { %v1591_v4 = vpop.permute.xlu1 %1590 }
0x1dfe   :  { %v1593_v6 = vmul.f32 %v1591_v4, %v1585_v43 }
0x1e00   :  { %1595 = vrot.lane.b32.xlu2 %v1593_v6, %s2481_s22 }
0x1e5a   :  { %v1596_v45 = vpop.permute.xlu2 %1595 }
0x1e5b   :  { %v1598_v46 = vadd.f32 %v1596_v45, %v1588_v44 }
0x1e5d   :  { %2094 = vtanh.f32 %v1598_v46 }
0x1e63   :  { %v2095_v47 = vpop.eup %2094 }
0x1e64   :  { %1601 = vrot.lane.b32.xlu0 %v2095_v47, %s2480_s1 }
0x1ed6   :  { %v1602_v49 = vpop.permute.xlu0 %1601 }
0x1ed7   :  { %v1604_v50 = vmul.f32 %v1602_v49, %v1585_v43 }
0x1ed9   :  { %1611 = vrot.lane.b32.xlu1 %v1604_v50, %s2481_s22 }
0x1f4b   :  { %v1612_v51 = vpop.permute.xlu1 %1611 }
0x1f4c   :  { %1961 = vmatmul.msk.f32.vlgmr.msra.gmra.mxu3 %vm241_vm1, %v1612_v51  ;;  %1962 = vmatmul.msk.f32.vlgmr.msra.gmra.mxu0 %vm241_vm1, %v1612_v51  ;;  %v1849_v51 = vld [vmem:[#allocation19] sm:$0x1] }
0x1f54   :  { %1967 = vmatmul.msk.f32.vlgmr.msrb.gmra.mxu0 %vm265_vm0, %v1756_v27 }
0x1fc9   :  { %v1660_v57 = vpop.f32.mrf.mxu0 }
0x1fca   :  { %v1684_v63 = vadd.f32 %v1683_v56, %v1660_v57 }
0x1fcc   :  { %v1687_v52 = vadd.f32 %v1686_v62, %v1684_v63 }
0x1fce   :  { %2096 = vtanh.f32 %v1687_v52  ;;  %v1964_v59 = vmul.f32 -1.442695, %v1687_v52 }
0x1fcf   :  { %v1632_v54 = vpop.f32.mrf.mxu3 }
0x1fd0   :  { %v1633_v55 = vadd.f32 %v1632_v54, %v1609_v53  ;;  %2098 = vpow2.f32 %v1964_v59 }
0x1fd1   :  { %v1803_v32 = vpop.f32.mrf.mxu0 }
0x1fd2   :  { %1635 = vst [vmem:[#allocation22 + $0x5] sm:$0x1] %v1633_v55 }
0x1fd4   :  { %v2097_v58 = vpop.eup %2096 }
0x1fd5   :  { %1710 = vrot.lane.b32.xlu2 %v2097_v58, %s2480_s1 }
0x1fd6   :  { %v2099_v60 = vpop.eup %2098 }
0x1fd7   :  { %v1691_v61 = vadd.f32 1.0, %v2099_v60 }
0x1fd9   :  { %2100 = vrcp.f32 %v1691_v61  ;;  %v1703_v14 = vand.u32 2147483648, %v1691_v61  ;;  %vm1697_vm15 = vweird.f32 %v1691_v61  ;;  %v1701_v15 = vand.u32 2147483647, %v1691_v61 }
0x1fdb   :  { %v1704_v17 = vor.u32 1.1754944e-38, %v1703_v14  ;;  %vm1702_vm3 = vcmp.eq.f32.partialorder %v1701_v15, 8.507059e+37 }
0x1fdf   :  { %v2101_v8 = vpop.eup %2100 }
0x1fe0   :  { %v1693_v9 = vmul.f32 %v2101_v8, %v1691_v61  ;;  %vm1698_vm14 = vweird.f32 %v2101_v8 }
0x1fe1   :  { %vm1699_vm2 = vmor %vm1697_vm15, %vm1698_vm14 }
0x1fe2   :  { %v1694_v11 = vsub.f32 1.0, %v1693_v9 }
0x1fe4   :  { %v1695_v12 = vmul.f32 %v2101_v8, %v1694_v11 }
0x1fe6   :  { %v1696_v13 = vadd.f32 %v2101_v8, %v1695_v12 }
0x1fe8   :  { %v1700_v16 = vsel %vm1699_vm2, %v2101_v8, %v1696_v13 }
0x1fe9   :  { %v1705_v19 = vsel %vm1702_vm3, %v1704_v17, %v1700_v16 }
0x1fea   :  { %v1708_v21 = vmul.f32 %v1705_v19, %v1598_v46 }
0x202f   :  { %v1711_v18 = vpop.permute.xlu2 %1710 }
0x2030   :  { %v1713_v20 = vmul.f32 %v1711_v18, %v1705_v19 }
0x2032   :  { %1715 = vrot.lane.b32.xlu0 %v1713_v20, %s2481_s22 }
0x20a4   :  { %v1716_v22 = vpop.permute.xlu0 %1715 }
0x20a5   :  { %v1718_v23 = vadd.f32 %v1716_v22, %v1708_v21 }
0x20a7   :  { %2102 = vtanh.f32 %v1718_v23 }
0x20ad   :  { %v2103_v24 = vpop.eup %2102 }
0x20ae   :  { %1721 = vrot.lane.b32.xlu1 %v2103_v24, %s2480_s1 }
0x2120   :  { %v1722_v25 = vpop.permute.xlu1 %1721 }
0x2121   :  { %v1724_v26 = vmul.f32 %v1722_v25, %v1705_v19 }
0x2123   :  { %1731 = vrot.lane.b32.xlu2 %v1724_v26, %s2481_s22 }
0x217d   :  { %v1732_v28 = vpop.permute.xlu2 %1731 }
0x217e   :  { %1965 = vmatmul.msk.f32.vlgmr.msrb.gmra.mxu1 %vm241_vm1, %v1732_v28  ;;  %1966 = vmatmul.msk.f32.vlgmr.msrb.gmra.mxu3 %vm241_vm1, %v1732_v28 }
0x21fb   :  { %v1752_v30 = vpop.f32.mrf.mxu1 }
0x21fc   :  { %v1753_v31 = vadd.f32 %v1752_v30, %v1729_v29 }
0x21fe   :  { %1755 = vst [vmem:[#allocation22 + $0x6] sm:$0x1] %v1753_v31 }
0x2201   :  { %v1780_v33 = vpop.f32.mrf.mxu3 }
0x2202   :  { %v1804_v35 = vadd.f32 %v1803_v32, %v1780_v33 }
0x2204   :  { %v1807_v36 = vadd.f32 %v1806_v34, %v1804_v35 }
0x2206   :  { %2104 = vtanh.f32 %v1807_v36  ;;  %v1968_v7 = vmul.f32 -1.442695, %v1807_v36 }
0x2208   :  { %2106 = vpow2.f32 %v1968_v7 }
0x220c   :  { %v2105_v5 = vpop.eup %2104 }
0x220d   :  { %1830 = vrot.lane.b32.xlu0 %v2105_v5, %s2480_s1 }
0x220e   :  { %v2107_v3 = vpop.eup %2106 }
0x220f   :  { %v1811_v39 = vadd.f32 1.0, %v2107_v3 }
0x2211   :  { %2108 = vrcp.f32 %v1811_v39  ;;  %v1823_v38 = vand.u32 2147483648, %v1811_v39  ;;  %vm1817_vm4 = vweird.f32 %v1811_v39  ;;  %v1821_v0 = vand.u32 2147483647, %v1811_v39 }
0x2213   :  { %v1824_v42 = vor.u32 1.1754944e-38, %v1823_v38  ;;  %vm1822_vm6 = vcmp.eq.f32.partialorder %v1821_v0, 8.507059e+37 }
0x2217   :  { %v2109_v40 = vpop.eup %2108 }
0x2218   :  { %v1813_v41 = vmul.f32 %v2109_v40, %v1811_v39  ;;  %vm1818_vm0 = vweird.f32 %v2109_v40 }
0x2219   :  { %vm1819_vm5 = vmor %vm1817_vm4, %vm1818_vm0 }
0x221a   :  { %v1814_v10 = vsub.f32 1.0, %v1813_v41 }
0x221c   :  { %v1815_v37 = vmul.f32 %v2109_v40, %v1814_v10 }
0x221e   :  { %v1816_v2 = vadd.f32 %v2109_v40, %v1815_v37 }
0x2220   :  { %v1820_v1 = vsel %vm1819_vm5, %v2109_v40, %v1816_v2 }
0x2221   :  { %v1825_v43 = vsel %vm1822_vm6, %v1824_v42, %v1820_v1 }
0x2222   :  { %v1828_v44 = vmul.f32 %v1825_v43, %v1718_v23 }
0x227f   :  { %v1831_v4 = vpop.permute.xlu0 %1830 }
0x2280   :  { %v1833_v6 = vmul.f32 %v1831_v4, %v1825_v43 }
0x2282   :  { %1835 = vrot.lane.b32.xlu1 %v1833_v6, %s2481_s22 }
0x22f4   :  { %v1836_v45 = vpop.permute.xlu1 %1835 }
0x22f5   :  { %v1838_v46 = vadd.f32 %v1836_v45, %v1828_v44 }
0x22f7   :  { %2110 = vtanh.f32 %v1838_v46 }
0x22fd   :  { %v2111_v47 = vpop.eup %2110 }
0x22fe   :  { %1841 = vrot.lane.b32.xlu2 %v2111_v47, %s2480_s1 }
0x2358   :  { %v1842_v48 = vpop.permute.xlu2 %1841 }
0x2359   :  { %v1844_v49 = vmul.f32 %v1842_v48, %v1825_v43 }
0x235b   :  { %1851 = vrot.lane.b32.xlu0 %v1844_v49, %s2481_s22 }
0x23cd   :  { %v1852_v50 = vpop.permute.xlu0 %1851 }
0x23ce   :  { %1969 = vmatmul.msk.f32.vlgmr.msrb.gmra.mxu2 %vm241_vm1, %v1852_v50 }
0x2451   :  { %v1872_v56 = vpop.f32.mrf.mxu2 }
0x2452   :  { %v1873_v57 = vadd.f32 %v1872_v56, %v1849_v51 }
0x2454   :  { %1875 = vst [vmem:[#allocation22 + $0x7] sm:$0x1] %v1873_v57 }
0x2455   :  { %1886 = dma.vmem_to_hbm [thread:$0]  %s1882_s24, 128, %s1884_s9, [#allocation4]  }
0x2456   :  { %2462 = dma.done.wait [#allocation4], 128  }
0x2457   :  { %2463 = vsyncadd [#allocation4], 4294967168 }
0x2458   :  { %2464 = dma.done.wait [#allocation24], 16  }
0x2459   :  { %2465 = vsyncadd [#allocation24], 4294967280 }
0x245a   :  { %1906 = vsyncpa [#allocation3], 1 }
0x245b   :  { %1907 = vsyncpa [#allocation6], 1 }
0x245c   :  { %1908 = vsyncpa [#allocation9], 1 }
0x245d   :  { %1909 = vsyncpa [#allocation12], 1 }
0x245e   :  { %1910 = vsyncpa [#allocation15], 1 }
0x245f   :  { %1911 = vsyncpa [#allocation18], 1 }
0x2460   :  { %1912 = vsyncpa [#allocation21], 1 }
0x2461   :  { %1913 = vsyncpa [#allocation4], 1 }
0x2462   :  { %1914 = vsyncpa [#allocation24], 1 }

</bundles_post_ra>
